<compile_context>
chip_gen: v7x
topology: tpu7x:2x2x1
jax: 0.10.0
libtpu: 0.0.40
codegen_flags: <defaults>
</compile_context>

<pallas_src>
import functools

import jax
import jax.numpy as jnp
from jax import lax
from jax.experimental import pallas as pl
from jax.experimental.pallas import tpu as pltpu


def _silu(v):
    # Exact SiLU for the unit test; prod builds can use
    # v * pl.reciprocal(1 + jnp.exp(-v), approx=True) (EUP slot, ~free).
    return v * (1.0 / (1.0 + jnp.exp(-v)))


def _spp_kernel(x_ref, w1_ref, b1_ref, w2_ref, b2_ref, row_ref, o_ref,
                *, H, W, C_, radii):
    """One image per grid step, channels-first, flattened spatial on lanes.

    x_ref  : (1, C1, S)          input slab, S = H*W on the lane axis
    w1_ref : (C_, C1)            cv1 1x1 weight, BN1 scale pre-folded
    b1_ref : (C_, 1)             folded BN1 bias
    w2_ref : (C2, (len(ks)+1)*C_)  cv2 1x1 weight, BN2 scale pre-folded
    b2_ref : (C2, 1)             folded BN2 bias
    row_ref: (1, S)              float row index (flat // W) for pool masks
    o_ref  : (1, C2, S)          output slab (lane-dense store)
    """
    S = H * W
    x = x_ref[0]                                            # (C1, S)

    # ---- cv1: 1x1 conv == one channel matmul, + folded BN bias + SiLU ------
    y = jnp.dot(w1_ref[...], x, preferred_element_type=jnp.float32)
    y = _silu(y + b1_ref[...])                              # (C_, S)

    # ---- pooling masks: built once, shared by every cascaded pool ----------
    # Rolling the (1, S) row-id vector with the *same* shifts as the data
    # keeps the masks exact and independent of the roll direction convention;
    # these 8 single-sublane rolls are negligible next to the (C_, S) data
    # rolls at production channel counts.
    row = row_ref[...]                                      # (1, S) f32
    neg_inf = jnp.float32(-jnp.inf)
    max_r = max(radii)
    w_shifts = {}   # d -> [(shift, mask)]: in-row neighbour at distance d
    h_shifts = {}   # d -> [(shift, mask)]: neighbour exactly d rows away
    for d in range(1, max_r + 1):
        wlist, hlist = [], []
        for s in (d, S - d):
            wlist.append((s, pltpu.roll(row, s, axis=1) == row))
        for s in (d * W, S - d * W):
            delta = pltpu.roll(row, s, axis=1) - row
            hlist.append((s, (delta == d) | (delta == -d)))   # exact, no range test
        w_shifts[d] = wlist
        h_shifts[d] = hlist

    def pool(v, r):
        # (2r+1) x (2r+1) max pool, stride 1, pad r, -inf padding, separable.
        m = v                                               # along-W max
        for d in range(1, r + 1):
            for s, mask in w_shifts[d]:
                m = jnp.maximum(
                    m, jnp.where(mask, pltpu.roll(v, s, axis=1), neg_inf))
        out = m                                             # along-H max
        for d in range(1, r + 1):
            for s, mask in h_shifts[d]:
                out = jnp.maximum(
                    out, jnp.where(mask, pltpu.roll(m, s, axis=1), neg_inf))
        return out

    # ---- cascaded pools (SPPF identity: 5 -> 9 -> 13) ----------------------
    feats = [y]
    v = y
    for r in radii:                                         # (2, 2, 2)
        v = pool(v, r)
        feats.append(v)

    # ---- cv2: accumulate per-feature matmuls (no concat VMEM scratch) ------
    w2 = w2_ref[...]                                        # (C2, 4*C_)
    z = jnp.dot(w2[:, 0:C_], feats[0], preferred_element_type=jnp.float32)
    for i in range(1, len(feats)):
        z = z + jnp.dot(w2[:, i * C_:(i + 1) * C_], feats[i],
                        preferred_element_type=jnp.float32)
    o_ref[0] = _silu(z + b2_ref[...]).astype(o_ref.dtype)


def spp_pallas(x_nchw, params, ks=(5, 9, 13)):
    """SPP forward pass. x_nchw: (N, C1, H, W) float32 -> (N, C2, H, W)."""
    w1f, b1, w2f, b2 = params
    N, C1, H, W = x_nchw.shape
    C_ = w1f.shape[0]
    C2 = w2f.shape[0]
    cat_c = C_ * (len(ks) + 1)
    assert w2f.shape[1] == cat_c

    # Cascade increments: pool radii compose additively for stride-1 max
    # pooling with -inf padding, so pool(r0) -> pool(r1-r0) -> pool(r2-r1)
    # reproduces the three original pools exactly.
    radii, prev = [], 0
    for k in ks:
        r = k // 2
        assert k % 2 == 1 and r > prev, "ks must be odd and strictly increasing"
        radii.append(r - prev)
        prev = r
    # Exact-equality row masks could alias a wrapped row only if H == 2*d.
    assert H > 2 * max(radii) and W > 1, "feature map too small for this kernel"

    S = H * W
    x_flat = x_nchw.reshape(N, C1, S)          # contiguous reshape, no transpose
    row_id = (jnp.arange(S, dtype=jnp.int32) // W).astype(jnp.float32).reshape(1, S)

    kernel = functools.partial(_spp_kernel, H=H, W=W, C_=C_, radii=tuple(radii))

    out = pl.pallas_call(
        kernel,
        out_shape=jax.ShapeDtypeStruct((N, C2, S), jnp.float32),
        grid_spec=pltpu.PrefetchScalarGridSpec(
            num_scalar_prefetch=0,
            grid=(N,),           # one image per step; N>=2 keeps both v7x TCs busy
            in_specs=[
                pl.BlockSpec((1, C1, S), lambda n: (n, 0, 0)),
                pl.BlockSpec((C_, C1), lambda n: (0, 0)),
                pl.BlockSpec((C_, 1), lambda n: (0, 0)),
                pl.BlockSpec((C2, cat_c), lambda n: (0, 0)),
                pl.BlockSpec((C2, 1), lambda n: (0, 0)),
                pl.BlockSpec((1, S), lambda n: (0, 0)),
            ],
            out_specs=pl.BlockSpec((1, C2, S), lambda n: (n, 0, 0)),
        ),
        compiler_params=pltpu.CompilerParams(
            dimension_semantics=("parallel",)),
    )(x_flat, w1f, b1, w2f, b2, row_id)

    return out.reshape(N, C2, H, W)


def make_params(key, c1, c2, ks=(5, 9, 13), eps=1e-5):
    """Synthetic Conv+BN(eval) params; BN scale folded into the conv weights."""
    c_ = c1 // 2
    cat_c = c_ * (len(ks) + 1)
    keys = jax.random.split(key, 10)
    w1 = 0.3 * jax.random.normal(keys[0], (c_, c1), jnp.float32)
    w2 = 0.15 * jax.random.normal(keys[1], (c2, cat_c), jnp.float32)

    def fold_bn(kg, kb, km, kv, c):
        gamma = 1.0 + 0.1 * jax.random.normal(kg, (c,), jnp.float32)
        beta = 0.1 * jax.random.normal(kb, (c,), jnp.float32)
        mean = 0.1 * jax.random.normal(km, (c,), jnp.float32)
        var = 1.0 + 0.1 * jnp.abs(jax.random.normal(kv, (c,), jnp.float32))
        scale = gamma * lax.rsqrt(var + eps)
        bias = beta - mean * scale
        return scale, bias

    s1, b1 = fold_bn(keys[2], keys[3], keys[4], keys[5], c_)
    s2, b2 = fold_bn(keys[6], keys[7], keys[8], keys[9], c2)
    w1f = w1 * s1[:, None]
    w2f = w2 * s2[:, None]
    return (w1f, b1.reshape(c_, 1), w2f, b2.reshape(c2, 1))


def spp_ref(x_nchw, params, ks=(5, 9, 13)):
    """Pure-JAX reference (inference-mode BN folded, same params as the kernel)."""
    w1f, b1, w2f, b2 = params
    dn = ("NCHW", "OIHW", "NCHW")
    hp = lax.Precision.HIGHEST
    y = lax.conv_general_dilated(x_nchw, w1f[:, :, None, None], (1, 1), "VALID",
                                 dimension_numbers=dn, precision=hp)
    y = jax.nn.silu(y + b1.reshape(1, -1, 1, 1))
    feats = [y]
    for k in ks:
        r = k // 2
        feats.append(lax.reduce_window(
            y, -jnp.inf, lax.max, (1, 1, k, k), (1, 1, 1, 1),
            ((0, 0), (0, 0), (r, r), (r, r))))
    cat = jnp.concatenate(feats, axis=1)
    z = lax.conv_general_dilated(cat, w2f[:, :, None, None], (1, 1), "VALID",
                                 dimension_numbers=dn, precision=hp)
    return jax.nn.silu(z + b2.reshape(1, -1, 1, 1))


if __name__ == "__main__":
    key = jax.random.PRNGKey(0)
    k_x, k_p = jax.random.split(key)

    N, C1, H, W = 2, 4, 16, 16
    C2 = 4
    x = jax.random.normal(k_x, (N, C1, H, W), jnp.float32)
    params = make_params(k_p, C1, C2)

    out = jax.block_until_ready(spp_pallas(x, params))
    ref = spp_ref(x, params)

    assert out.shape == (N, C2, H, W)
    max_err = float(jnp.max(jnp.abs(out - ref)))
    # Tolerance covers MXU f32-emulation vs the HIGHEST-precision XLA conv
    # reference (~1e-3 worst case); structural/mask errors show up at >=1e-2.
    assert jnp.allclose(out, ref, atol=5e-3, rtol=5e-3), max_err

    print("KERNEL_OK")
</pallas_src>

<mosaic_0001>
module attributes {stable_mosaic.version = 11 : i64} {
  func.func @_spp_kernel(%arg0: i32, %arg1: memref<1x4x256xf32, #tpu.memory_space<vmem>>, %arg2: memref<2x4xf32, #tpu.memory_space<vmem>>, %arg3: memref<2x1xf32, #tpu.memory_space<vmem>>, %arg4: memref<4x8xf32, #tpu.memory_space<vmem>>, %arg5: memref<4x1xf32, #tpu.memory_space<vmem>>, %arg6: memref<1x256xf32, #tpu.memory_space<vmem>>, %arg7: memref<1x4x256xf32, #tpu.memory_space<vmem>>) attributes {dimension_semantics = [#tpu.dimension_semantics<parallel>], iteration_bounds = array<i64: 2>, scalar_prefetch = 0 : i64, scratch_operands = 0 : i64, tpu.core_type = #tpu.core_type<tc>, window_params = [{transform_indices = @transform_0, window_bounds = array<i64: 1, 4, 256>}, {pipeline_mode = #tpu.pipeline_mode<synchronous>, transform_indices = @transform_1, window_bounds = array<i64: 2, 4>}, {pipeline_mode = #tpu.pipeline_mode<synchronous>, transform_indices = @transform_2, window_bounds = array<i64: 2, 1>}, {pipeline_mode = #tpu.pipeline_mode<synchronous>, transform_indices = @transform_3, window_bounds = array<i64: 4, 8>}, {pipeline_mode = #tpu.pipeline_mode<synchronous>, transform_indices = @transform_4, window_bounds = array<i64: 4, 1>}, {pipeline_mode = #tpu.pipeline_mode<synchronous>, transform_indices = @transform_5, window_bounds = array<i64: 1, 256>}, {transform_indices = @transform_6, window_bounds = array<i64: 1, 4, 256>}]} {
    %c0 = arith.constant 0 : index
    %c0_0 = arith.constant 0 : index
    %c0_1 = arith.constant 0 : index
    %0 = vector.load %arg1[%c0, %c0_0, %c0_1] : memref<1x4x256xf32, #tpu.memory_space<vmem>>, vector<1x4x256xf32>
    %1 = vector.shape_cast %0 : vector<1x4x256xf32> to vector<4x256xf32>
    %c0_2 = arith.constant 0 : index
    %c0_3 = arith.constant 0 : index
    %2 = vector.load %arg2[%c0_2, %c0_3] : memref<2x4xf32, #tpu.memory_space<vmem>>, vector<2x4xf32>
    %cst = arith.constant dense<0.000000e+00> : vector<2x256xf32>
    %3 = tpu.matmul %2, %1, %cst {dimension_numbers = #tpu.dot_dimension_numbers<[1], [0], [0], [1], [0, 0, 1, 1], [], []>} : vector<2x4xf32>, vector<4x256xf32>, vector<2x256xf32> -> vector<2x256xf32>
    %c0_4 = arith.constant 0 : index
    %c0_5 = arith.constant 0 : index
    %4 = vector.load %arg3[%c0_4, %c0_5] : memref<2x1xf32, #tpu.memory_space<vmem>>, vector<2x1xf32>
    %5 = vector.broadcast %4 : vector<2x1xf32> to vector<2x256xf32>
    %6 = arith.addf %3, %5 : vector<2x256xf32>
    %cst_6 = arith.constant 0.000000e+00 : f32
    %7 = vector.broadcast %cst_6 : f32 to vector<2x256xf32>
    %8 = arith.subf %7, %6 : vector<2x256xf32>
    %9 = math.exp %8 : vector<2x256xf32>
    %cst_7 = arith.constant 1.000000e+00 : f32
    %10 = vector.broadcast %cst_7 : f32 to vector<2x256xf32>
    %11 = arith.addf %10, %9 : vector<2x256xf32>
    %cst_8 = arith.constant 1.000000e+00 : f32
    %12 = vector.broadcast %cst_8 : f32 to vector<2x256xf32>
    %13 = arith.divf %12, %11 : vector<2x256xf32>
    %14 = arith.mulf %6, %13 : vector<2x256xf32>
    %c0_9 = arith.constant 0 : index
    %c0_10 = arith.constant 0 : index
    %15 = vector.load %arg6[%c0_9, %c0_10] : memref<1x256xf32, #tpu.memory_space<vmem>>, vector<1x256xf32>
    %c1_i32 = arith.constant 1 : i32
    %16 = tpu.dynamic_rotate %15 by %c1_i32 dim 1 : vector<1x256xf32>, i32 -> vector<1x256xf32>
    %17 = arith.cmpf oeq, %16, %15 : vector<1x256xf32>
    %c255_i32 = arith.constant 255 : i32
    %18 = tpu.dynamic_rotate %15 by %c255_i32 dim 1 : vector<1x256xf32>, i32 -> vector<1x256xf32>
    %19 = arith.cmpf oeq, %18, %15 : vector<1x256xf32>
    %c16_i32 = arith.constant 16 : i32
    %20 = tpu.dynamic_rotate %15 by %c16_i32 dim 1 : vector<1x256xf32>, i32 -> vector<1x256xf32>
    %21 = arith.subf %20, %15 : vector<1x256xf32>
    %cst_11 = arith.constant 1.000000e+00 : f32
    %22 = vector.broadcast %cst_11 : f32 to vector<1x256xf32>
    %23 = arith.cmpf oeq, %21, %22 : vector<1x256xf32>
    %cst_12 = arith.constant -1.000000e+00 : f32
    %24 = vector.broadcast %cst_12 : f32 to vector<1x256xf32>
    %25 = arith.cmpf oeq, %21, %24 : vector<1x256xf32>
    %26 = arith.ori %23, %25 : vector<1x256xi1>
    %c240_i32 = arith.constant 240 : i32
    %27 = tpu.dynamic_rotate %15 by %c240_i32 dim 1 : vector<1x256xf32>, i32 -> vector<1x256xf32>
    %28 = arith.subf %27, %15 : vector<1x256xf32>
    %cst_13 = arith.constant 1.000000e+00 : f32
    %29 = vector.broadcast %cst_13 : f32 to vector<1x256xf32>
    %30 = arith.cmpf oeq, %28, %29 : vector<1x256xf32>
    %cst_14 = arith.constant -1.000000e+00 : f32
    %31 = vector.broadcast %cst_14 : f32 to vector<1x256xf32>
    %32 = arith.cmpf oeq, %28, %31 : vector<1x256xf32>
    %33 = arith.ori %30, %32 : vector<1x256xi1>
    %c2_i32 = arith.constant 2 : i32
    %34 = tpu.dynamic_rotate %15 by %c2_i32 dim 1 : vector<1x256xf32>, i32 -> vector<1x256xf32>
    %35 = arith.cmpf oeq, %34, %15 : vector<1x256xf32>
    %c254_i32 = arith.constant 254 : i32
    %36 = tpu.dynamic_rotate %15 by %c254_i32 dim 1 : vector<1x256xf32>, i32 -> vector<1x256xf32>
    %37 = arith.cmpf oeq, %36, %15 : vector<1x256xf32>
    %c32_i32 = arith.constant 32 : i32
    %38 = tpu.dynamic_rotate %15 by %c32_i32 dim 1 : vector<1x256xf32>, i32 -> vector<1x256xf32>
    %39 = arith.subf %38, %15 : vector<1x256xf32>
    %cst_15 = arith.constant 2.000000e+00 : f32
    %40 = vector.broadcast %cst_15 : f32 to vector<1x256xf32>
    %41 = arith.cmpf oeq, %39, %40 : vector<1x256xf32>
    %cst_16 = arith.constant -2.000000e+00 : f32
    %42 = vector.broadcast %cst_16 : f32 to vector<1x256xf32>
    %43 = arith.cmpf oeq, %39, %42 : vector<1x256xf32>
    %44 = arith.ori %41, %43 : vector<1x256xi1>
    %c224_i32 = arith.constant 224 : i32
    %45 = tpu.dynamic_rotate %15 by %c224_i32 dim 1 : vector<1x256xf32>, i32 -> vector<1x256xf32>
    %46 = arith.subf %45, %15 : vector<1x256xf32>
    %cst_17 = arith.constant 2.000000e+00 : f32
    %47 = vector.broadcast %cst_17 : f32 to vector<1x256xf32>
    %48 = arith.cmpf oeq, %46, %47 : vector<1x256xf32>
    %cst_18 = arith.constant -2.000000e+00 : f32
    %49 = vector.broadcast %cst_18 : f32 to vector<1x256xf32>
    %50 = arith.cmpf oeq, %46, %49 : vector<1x256xf32>
    %51 = arith.ori %48, %50 : vector<1x256xi1>
    %c1_i32_19 = arith.constant 1 : i32
    %52 = tpu.dynamic_rotate %14 by %c1_i32_19 dim 1 : vector<2x256xf32>, i32 -> vector<2x256xf32>
    %cst_20 = arith.constant 0xFF800000 : f32
    %53 = vector.shape_cast %17 : vector<1x256xi1> to vector<1x256xi1>
    %54 = vector.broadcast %53 : vector<1x256xi1> to vector<2x256xi1>
    %55 = vector.broadcast %cst_20 : f32 to vector<2x256xf32>
    %56 = arith.select %54, %52, %55 : vector<2x256xi1>, vector<2x256xf32>
    %57 = arith.maximumf %14, %56 : vector<2x256xf32>
    %c255_i32_21 = arith.constant 255 : i32
    %58 = tpu.dynamic_rotate %14 by %c255_i32_21 dim 1 : vector<2x256xf32>, i32 -> vector<2x256xf32>
    %cst_22 = arith.constant 0xFF800000 : f32
    %59 = vector.shape_cast %19 : vector<1x256xi1> to vector<1x256xi1>
    %60 = vector.broadcast %59 : vector<1x256xi1> to vector<2x256xi1>
    %61 = vector.broadcast %cst_22 : f32 to vector<2x256xf32>
    %62 = arith.select %60, %58, %61 : vector<2x256xi1>, vector<2x256xf32>
    %63 = arith.maximumf %57, %62 : vector<2x256xf32>
    %c2_i32_23 = arith.constant 2 : i32
    %64 = tpu.dynamic_rotate %14 by %c2_i32_23 dim 1 : vector<2x256xf32>, i32 -> vector<2x256xf32>
    %cst_24 = arith.constant 0xFF800000 : f32
    %65 = vector.shape_cast %35 : vector<1x256xi1> to vector<1x256xi1>
    %66 = vector.broadcast %65 : vector<1x256xi1> to vector<2x256xi1>
    %67 = vector.broadcast %cst_24 : f32 to vector<2x256xf32>
    %68 = arith.select %66, %64, %67 : vector<2x256xi1>, vector<2x256xf32>
    %69 = arith.maximumf %63, %68 : vector<2x256xf32>
    %c254_i32_25 = arith.constant 254 : i32
    %70 = tpu.dynamic_rotate %14 by %c254_i32_25 dim 1 : vector<2x256xf32>, i32 -> vector<2x256xf32>
    %cst_26 = arith.constant 0xFF800000 : f32
    %71 = vector.shape_cast %37 : vector<1x256xi1> to vector<1x256xi1>
    %72 = vector.broadcast %71 : vector<1x256xi1> to vector<2x256xi1>
    %73 = vector.broadcast %cst_26 : f32 to vector<2x256xf32>
    %74 = arith.select %72, %70, %73 : vector<2x256xi1>, vector<2x256xf32>
    %75 = arith.maximumf %69, %74 : vector<2x256xf32>
    %c16_i32_27 = arith.constant 16 : i32
    %76 = tpu.dynamic_rotate %75 by %c16_i32_27 dim 1 : vector<2x256xf32>, i32 -> vector<2x256xf32>
    %cst_28 = arith.constant 0xFF800000 : f32
    %77 = vector.shape_cast %26 : vector<1x256xi1> to vector<1x256xi1>
    %78 = vector.broadcast %77 : vector<1x256xi1> to vector<2x256xi1>
    %79 = vector.broadcast %cst_28 : f32 to vector<2x256xf32>
    %80 = arith.select %78, %76, %79 : vector<2x256xi1>, vector<2x256xf32>
    %81 = arith.maximumf %75, %80 : vector<2x256xf32>
    %c240_i32_29 = arith.constant 240 : i32
    %82 = tpu.dynamic_rotate %75 by %c240_i32_29 dim 1 : vector<2x256xf32>, i32 -> vector<2x256xf32>
    %cst_30 = arith.constant 0xFF800000 : f32
    %83 = vector.shape_cast %33 : vector<1x256xi1> to vector<1x256xi1>
    %84 = vector.broadcast %83 : vector<1x256xi1> to vector<2x256xi1>
    %85 = vector.broadcast %cst_30 : f32 to vector<2x256xf32>
    %86 = arith.select %84, %82, %85 : vector<2x256xi1>, vector<2x256xf32>
    %87 = arith.maximumf %81, %86 : vector<2x256xf32>
    %c32_i32_31 = arith.constant 32 : i32
    %88 = tpu.dynamic_rotate %75 by %c32_i32_31 dim 1 : vector<2x256xf32>, i32 -> vector<2x256xf32>
    %cst_32 = arith.constant 0xFF800000 : f32
    %89 = vector.shape_cast %44 : vector<1x256xi1> to vector<1x256xi1>
    %90 = vector.broadcast %89 : vector<1x256xi1> to vector<2x256xi1>
    %91 = vector.broadcast %cst_32 : f32 to vector<2x256xf32>
    %92 = arith.select %90, %88, %91 : vector<2x256xi1>, vector<2x256xf32>
    %93 = arith.maximumf %87, %92 : vector<2x256xf32>
    %c224_i32_33 = arith.constant 224 : i32
    %94 = tpu.dynamic_rotate %75 by %c224_i32_33 dim 1 : vector<2x256xf32>, i32 -> vector<2x256xf32>
    %cst_34 = arith.constant 0xFF800000 : f32
    %95 = vector.shape_cast %51 : vector<1x256xi1> to vector<1x256xi1>
    %96 = vector.broadcast %95 : vector<1x256xi1> to vector<2x256xi1>
    %97 = vector.broadcast %cst_34 : f32 to vector<2x256xf32>
    %98 = arith.select %96, %94, %97 : vector<2x256xi1>, vector<2x256xf32>
    %99 = arith.maximumf %93, %98 : vector<2x256xf32>
    %c1_i32_35 = arith.constant 1 : i32
    %100 = tpu.dynamic_rotate %99 by %c1_i32_35 dim 1 : vector<2x256xf32>, i32 -> vector<2x256xf32>
    %cst_36 = arith.constant 0xFF800000 : f32
    %101 = vector.shape_cast %17 : vector<1x256xi1> to vector<1x256xi1>
    %102 = vector.broadcast %101 : vector<1x256xi1> to vector<2x256xi1>
    %103 = vector.broadcast %cst_36 : f32 to vector<2x256xf32>
    %104 = arith.select %102, %100, %103 : vector<2x256xi1>, vector<2x256xf32>
    %105 = arith.maximumf %99, %104 : vector<2x256xf32>
    %c255_i32_37 = arith.constant 255 : i32
    %106 = tpu.dynamic_rotate %99 by %c255_i32_37 dim 1 : vector<2x256xf32>, i32 -> vector<2x256xf32>
    %cst_38 = arith.constant 0xFF800000 : f32
    %107 = vector.shape_cast %19 : vector<1x256xi1> to vector<1x256xi1>
    %108 = vector.broadcast %107 : vector<1x256xi1> to vector<2x256xi1>
    %109 = vector.broadcast %cst_38 : f32 to vector<2x256xf32>
    %110 = arith.select %108, %106, %109 : vector<2x256xi1>, vector<2x256xf32>
    %111 = arith.maximumf %105, %110 : vector<2x256xf32>
    %c2_i32_39 = arith.constant 2 : i32
    %112 = tpu.dynamic_rotate %99 by %c2_i32_39 dim 1 : vector<2x256xf32>, i32 -> vector<2x256xf32>
    %cst_40 = arith.constant 0xFF800000 : f32
    %113 = vector.shape_cast %35 : vector<1x256xi1> to vector<1x256xi1>
    %114 = vector.broadcast %113 : vector<1x256xi1> to vector<2x256xi1>
    %115 = vector.broadcast %cst_40 : f32 to vector<2x256xf32>
    %116 = arith.select %114, %112, %115 : vector<2x256xi1>, vector<2x256xf32>
    %117 = arith.maximumf %111, %116 : vector<2x256xf32>
    %c254_i32_41 = arith.constant 254 : i32
    %118 = tpu.dynamic_rotate %99 by %c254_i32_41 dim 1 : vector<2x256xf32>, i32 -> vector<2x256xf32>
    %cst_42 = arith.constant 0xFF800000 : f32
    %119 = vector.shape_cast %37 : vector<1x256xi1> to vector<1x256xi1>
    %120 = vector.broadcast %119 : vector<1x256xi1> to vector<2x256xi1>
    %121 = vector.broadcast %cst_42 : f32 to vector<2x256xf32>
    %122 = arith.select %120, %118, %121 : vector<2x256xi1>, vector<2x256xf32>
    %123 = arith.maximumf %117, %122 : vector<2x256xf32>
    %c16_i32_43 = arith.constant 16 : i32
    %124 = tpu.dynamic_rotate %123 by %c16_i32_43 dim 1 : vector<2x256xf32>, i32 -> vector<2x256xf32>
    %cst_44 = arith.constant 0xFF800000 : f32
    %125 = vector.shape_cast %26 : vector<1x256xi1> to vector<1x256xi1>
    %126 = vector.broadcast %125 : vector<1x256xi1> to vector<2x256xi1>
    %127 = vector.broadcast %cst_44 : f32 to vector<2x256xf32>
    %128 = arith.select %126, %124, %127 : vector<2x256xi1>, vector<2x256xf32>
    %129 = arith.maximumf %123, %128 : vector<2x256xf32>
    %c240_i32_45 = arith.constant 240 : i32
    %130 = tpu.dynamic_rotate %123 by %c240_i32_45 dim 1 : vector<2x256xf32>, i32 -> vector<2x256xf32>
    %cst_46 = arith.constant 0xFF800000 : f32
    %131 = vector.shape_cast %33 : vector<1x256xi1> to vector<1x256xi1>
    %132 = vector.broadcast %131 : vector<1x256xi1> to vector<2x256xi1>
    %133 = vector.broadcast %cst_46 : f32 to vector<2x256xf32>
    %134 = arith.select %132, %130, %133 : vector<2x256xi1>, vector<2x256xf32>
    %135 = arith.maximumf %129, %134 : vector<2x256xf32>
    %c32_i32_47 = arith.constant 32 : i32
    %136 = tpu.dynamic_rotate %123 by %c32_i32_47 dim 1 : vector<2x256xf32>, i32 -> vector<2x256xf32>
    %cst_48 = arith.constant 0xFF800000 : f32
    %137 = vector.shape_cast %44 : vector<1x256xi1> to vector<1x256xi1>
    %138 = vector.broadcast %137 : vector<1x256xi1> to vector<2x256xi1>
    %139 = vector.broadcast %cst_48 : f32 to vector<2x256xf32>
    %140 = arith.select %138, %136, %139 : vector<2x256xi1>, vector<2x256xf32>
    %141 = arith.maximumf %135, %140 : vector<2x256xf32>
    %c224_i32_49 = arith.constant 224 : i32
    %142 = tpu.dynamic_rotate %123 by %c224_i32_49 dim 1 : vector<2x256xf32>, i32 -> vector<2x256xf32>
    %cst_50 = arith.constant 0xFF800000 : f32
    %143 = vector.shape_cast %51 : vector<1x256xi1> to vector<1x256xi1>
    %144 = vector.broadcast %143 : vector<1x256xi1> to vector<2x256xi1>
    %145 = vector.broadcast %cst_50 : f32 to vector<2x256xf32>
    %146 = arith.select %144, %142, %145 : vector<2x256xi1>, vector<2x256xf32>
    %147 = arith.maximumf %141, %146 : vector<2x256xf32>
    %c1_i32_51 = arith.constant 1 : i32
    %148 = tpu.dynamic_rotate %147 by %c1_i32_51 dim 1 : vector<2x256xf32>, i32 -> vector<2x256xf32>
    %cst_52 = arith.constant 0xFF800000 : f32
    %149 = vector.shape_cast %17 : vector<1x256xi1> to vector<1x256xi1>
    %150 = vector.broadcast %149 : vector<1x256xi1> to vector<2x256xi1>
    %151 = vector.broadcast %cst_52 : f32 to vector<2x256xf32>
    %152 = arith.select %150, %148, %151 : vector<2x256xi1>, vector<2x256xf32>
    %153 = arith.maximumf %147, %152 : vector<2x256xf32>
    %c255_i32_53 = arith.constant 255 : i32
    %154 = tpu.dynamic_rotate %147 by %c255_i32_53 dim 1 : vector<2x256xf32>, i32 -> vector<2x256xf32>
    %cst_54 = arith.constant 0xFF800000 : f32
    %155 = vector.shape_cast %19 : vector<1x256xi1> to vector<1x256xi1>
    %156 = vector.broadcast %155 : vector<1x256xi1> to vector<2x256xi1>
    %157 = vector.broadcast %cst_54 : f32 to vector<2x256xf32>
    %158 = arith.select %156, %154, %157 : vector<2x256xi1>, vector<2x256xf32>
    %159 = arith.maximumf %153, %158 : vector<2x256xf32>
    %c2_i32_55 = arith.constant 2 : i32
    %160 = tpu.dynamic_rotate %147 by %c2_i32_55 dim 1 : vector<2x256xf32>, i32 -> vector<2x256xf32>
    %cst_56 = arith.constant 0xFF800000 : f32
    %161 = vector.shape_cast %35 : vector<1x256xi1> to vector<1x256xi1>
    %162 = vector.broadcast %161 : vector<1x256xi1> to vector<2x256xi1>
    %163 = vector.broadcast %cst_56 : f32 to vector<2x256xf32>
    %164 = arith.select %162, %160, %163 : vector<2x256xi1>, vector<2x256xf32>
    %165 = arith.maximumf %159, %164 : vector<2x256xf32>
    %c254_i32_57 = arith.constant 254 : i32
    %166 = tpu.dynamic_rotate %147 by %c254_i32_57 dim 1 : vector<2x256xf32>, i32 -> vector<2x256xf32>
    %cst_58 = arith.constant 0xFF800000 : f32
    %167 = vector.shape_cast %37 : vector<1x256xi1> to vector<1x256xi1>
    %168 = vector.broadcast %167 : vector<1x256xi1> to vector<2x256xi1>
    %169 = vector.broadcast %cst_58 : f32 to vector<2x256xf32>
    %170 = arith.select %168, %166, %169 : vector<2x256xi1>, vector<2x256xf32>
    %171 = arith.maximumf %165, %170 : vector<2x256xf32>
    %c16_i32_59 = arith.constant 16 : i32
    %172 = tpu.dynamic_rotate %171 by %c16_i32_59 dim 1 : vector<2x256xf32>, i32 -> vector<2x256xf32>
    %cst_60 = arith.constant 0xFF800000 : f32
    %173 = vector.shape_cast %26 : vector<1x256xi1> to vector<1x256xi1>
    %174 = vector.broadcast %173 : vector<1x256xi1> to vector<2x256xi1>
    %175 = vector.broadcast %cst_60 : f32 to vector<2x256xf32>
    %176 = arith.select %174, %172, %175 : vector<2x256xi1>, vector<2x256xf32>
    %177 = arith.maximumf %171, %176 : vector<2x256xf32>
    %c240_i32_61 = arith.constant 240 : i32
    %178 = tpu.dynamic_rotate %171 by %c240_i32_61 dim 1 : vector<2x256xf32>, i32 -> vector<2x256xf32>
    %cst_62 = arith.constant 0xFF800000 : f32
    %179 = vector.shape_cast %33 : vector<1x256xi1> to vector<1x256xi1>
    %180 = vector.broadcast %179 : vector<1x256xi1> to vector<2x256xi1>
    %181 = vector.broadcast %cst_62 : f32 to vector<2x256xf32>
    %182 = arith.select %180, %178, %181 : vector<2x256xi1>, vector<2x256xf32>
    %183 = arith.maximumf %177, %182 : vector<2x256xf32>
    %c32_i32_63 = arith.constant 32 : i32
    %184 = tpu.dynamic_rotate %171 by %c32_i32_63 dim 1 : vector<2x256xf32>, i32 -> vector<2x256xf32>
    %cst_64 = arith.constant 0xFF800000 : f32
    %185 = vector.shape_cast %44 : vector<1x256xi1> to vector<1x256xi1>
    %186 = vector.broadcast %185 : vector<1x256xi1> to vector<2x256xi1>
    %187 = vector.broadcast %cst_64 : f32 to vector<2x256xf32>
    %188 = arith.select %186, %184, %187 : vector<2x256xi1>, vector<2x256xf32>
    %189 = arith.maximumf %183, %188 : vector<2x256xf32>
    %c224_i32_65 = arith.constant 224 : i32
    %190 = tpu.dynamic_rotate %171 by %c224_i32_65 dim 1 : vector<2x256xf32>, i32 -> vector<2x256xf32>
    %cst_66 = arith.constant 0xFF800000 : f32
    %191 = vector.shape_cast %51 : vector<1x256xi1> to vector<1x256xi1>
    %192 = vector.broadcast %191 : vector<1x256xi1> to vector<2x256xi1>
    %193 = vector.broadcast %cst_66 : f32 to vector<2x256xf32>
    %194 = arith.select %192, %190, %193 : vector<2x256xi1>, vector<2x256xf32>
    %195 = arith.maximumf %189, %194 : vector<2x256xf32>
    %c0_67 = arith.constant 0 : index
    %c0_68 = arith.constant 0 : index
    %196 = vector.load %arg4[%c0_67, %c0_68] : memref<4x8xf32, #tpu.memory_space<vmem>>, vector<4x8xf32>
    %197 = vector.extract_strided_slice %196 {offsets = [0, 0], sizes = [4, 2], strides = [1, 1]} : vector<4x8xf32> to vector<4x2xf32>
    %cst_69 = arith.constant dense<0.000000e+00> : vector<4x256xf32>
    %198 = tpu.matmul %197, %14, %cst_69 {dimension_numbers = #tpu.dot_dimension_numbers<[1], [0], [0], [1], [0, 0, 1, 1], [], []>} : vector<4x2xf32>, vector<2x256xf32>, vector<4x256xf32> -> vector<4x256xf32>
    %199 = vector.extract_strided_slice %196 {offsets = [0, 2], sizes = [4, 2], strides = [1, 1]} : vector<4x8xf32> to vector<4x2xf32>
    %cst_70 = arith.constant dense<0.000000e+00> : vector<4x256xf32>
    %200 = tpu.matmul %199, %99, %cst_70 {dimension_numbers = #tpu.dot_dimension_numbers<[1], [0], [0], [1], [0, 0, 1, 1], [], []>} : vector<4x2xf32>, vector<2x256xf32>, vector<4x256xf32> -> vector<4x256xf32>
    %201 = arith.addf %198, %200 : vector<4x256xf32>
    %202 = vector.extract_strided_slice %196 {offsets = [0, 4], sizes = [4, 2], strides = [1, 1]} : vector<4x8xf32> to vector<4x2xf32>
    %cst_71 = arith.constant dense<0.000000e+00> : vector<4x256xf32>
    %203 = tpu.matmul %202, %147, %cst_71 {dimension_numbers = #tpu.dot_dimension_numbers<[1], [0], [0], [1], [0, 0, 1, 1], [], []>} : vector<4x2xf32>, vector<2x256xf32>, vector<4x256xf32> -> vector<4x256xf32>
    %204 = arith.addf %201, %203 : vector<4x256xf32>
    %205 = vector.extract_strided_slice %196 {offsets = [0, 6], sizes = [4, 2], strides = [1, 1]} : vector<4x8xf32> to vector<4x2xf32>
    %cst_72 = arith.constant dense<0.000000e+00> : vector<4x256xf32>
    %206 = tpu.matmul %205, %195, %cst_72 {dimension_numbers = #tpu.dot_dimension_numbers<[1], [0], [0], [1], [0, 0, 1, 1], [], []>} : vector<4x2xf32>, vector<2x256xf32>, vector<4x256xf32> -> vector<4x256xf32>
    %207 = arith.addf %204, %206 : vector<4x256xf32>
    %c0_73 = arith.constant 0 : index
    %c0_74 = arith.constant 0 : index
    %208 = vector.load %arg5[%c0_73, %c0_74] : memref<4x1xf32, #tpu.memory_space<vmem>>, vector<4x1xf32>
    %209 = vector.broadcast %208 : vector<4x1xf32> to vector<4x256xf32>
    %210 = arith.addf %207, %209 : vector<4x256xf32>
    %cst_75 = arith.constant 0.000000e+00 : f32
    %211 = vector.broadcast %cst_75 : f32 to vector<4x256xf32>
    %212 = arith.subf %211, %210 : vector<4x256xf32>
    %213 = math.exp %212 : vector<4x256xf32>
    %cst_76 = arith.constant 1.000000e+00 : f32
    %214 = vector.broadcast %cst_76 : f32 to vector<4x256xf32>
    %215 = arith.addf %214, %213 : vector<4x256xf32>
    %cst_77 = arith.constant 1.000000e+00 : f32
    %216 = vector.broadcast %cst_77 : f32 to vector<4x256xf32>
    %217 = arith.divf %216, %215 : vector<4x256xf32>
    %218 = arith.mulf %210, %217 : vector<4x256xf32>
    %c0_78 = arith.constant 0 : index
    %c0_79 = arith.constant 0 : index
    %c0_80 = arith.constant 0 : index
    %219 = vector.load %arg7[%c0_78, %c0_79, %c0_80] : memref<1x4x256xf32, #tpu.memory_space<vmem>>, vector<1x4x256xf32>
    %220 = vector.shape_cast %219 : vector<1x4x256xf32> to vector<4x256xf32>
    %221 = vector.shape_cast %218 : vector<4x256xf32> to vector<1x4x256xf32>
    tpu.vector_store %arg7[%c0_78, %c0_79, %c0_80], %221 {strides = array<i32>} : memref<1x4x256xf32, #tpu.memory_space<vmem>>, vector<1x4x256xf32>,
    return
  }
  func.func @transform_0(%arg0: i32) -> (i32, i32, i32) {
    %c0_i32 = arith.constant 0 : i32
    %c0_i32_0 = arith.constant 0 : i32
    %c0_i32_1 = arith.constant 0 : i32
    return %arg0, %c0_i32, %c0_i32_0 : i32, i32, i32
  }
  func.func @transform_1(%arg0: i32) -> (i32, i32) {
    %c0_i32 = arith.constant 0 : i32
    %c0_i32_0 = arith.constant 0 : i32
    %c0_i32_1 = arith.constant 0 : i32
    return %c0_i32, %c0_i32_0 : i32, i32
  }
  func.func @transform_2(%arg0: i32) -> (i32, i32) {
    %c0_i32 = arith.constant 0 : i32
    %c0_i32_0 = arith.constant 0 : i32
    %c0_i32_1 = arith.constant 0 : i32
    return %c0_i32, %c0_i32_0 : i32, i32
  }
  func.func @transform_3(%arg0: i32) -> (i32, i32) {
    %c0_i32 = arith.constant 0 : i32
    %c0_i32_0 = arith.constant 0 : i32
    %c0_i32_1 = arith.constant 0 : i32
    return %c0_i32, %c0_i32_0 : i32, i32
  }
  func.func @transform_4(%arg0: i32) -> (i32, i32) {
    %c0_i32 = arith.constant 0 : i32
    %c0_i32_0 = arith.constant 0 : i32
    %c0_i32_1 = arith.constant 0 : i32
    return %c0_i32, %c0_i32_0 : i32, i32
  }
  func.func @transform_5(%arg0: i32) -> (i32, i32) {
    %c0_i32 = arith.constant 0 : i32
    %c0_i32_0 = arith.constant 0 : i32
    %c0_i32_1 = arith.constant 0 : i32
    return %c0_i32, %c0_i32_0 : i32, i32
  }
  func.func @transform_6(%arg0: i32) -> (i32, i32, i32) {
    %c0_i32 = arith.constant 0 : i32
    %c0_i32_0 = arith.constant 0 : i32
    %c0_i32_1 = arith.constant 0 : i32
    return %arg0, %c0_i32, %c0_i32_0 : i32, i32, i32
  }
}

</mosaic_0001>

<bundles_post_ra>
// kernel: tpu_custom_call.1
= control target key start
LH: loop header
LB: loop body
LE: loop exit
PB: predicated region body
PF: predicated region fallthrough
CT: control target
= control target key end

     0   :  { %11 = vsyncpa [#allocation3], 0  ;;  %s2196_s0 = inlined_call_operand.hbm [shape: f32[2,4,256], index: 0, kind: input, shape index: {}]   ;;  %s2197_s1 = inlined_call_operand.vmem [shape: f32[2,4], index: 1, kind: input, shape index: {}]   ;;  %s2198_s2 = inlined_call_operand.vmem [shape: f32[2,1], index: 2, kind: input, shape index: {}]   ;;  %s2199_s3 = inlined_call_operand.vmem [shape: f32[4,8], index: 3, kind: input, shape index: {}]   ;;  %s2200_s4 = inlined_call_operand.vmem [shape: f32[4,1], index: 4, kind: input, shape index: {}]   ;;  %s2201_s5 = inlined_call_operand.vmem [shape: f32[1,256], index: 5, kind: input, shape index: {}]   ;;  %s2202_s6 = inlined_call_operand.hbm [shape: f32[2,4,256], index: 6, kind: output, shape index: {}]  }
   0x1   :  { %13 = vsyncpa [#allocation3 + $0x1], 0 }
   0x2   :  { %14 = vsyncpa [#allocation4], 0 }
   0x3   :  { %16 = vsyncpa [#allocation4 + $0x1], 0  ;;  %s1520_s21 = smov 0   ;;  %s1522_s22 = smov 0  }
   0x4   :  { %s1524_s23 = smov 0   ;;  %s1526_s24 = smov 0  }
   0x5 LB: > { %s1541_s25 = sadd.s32 4294967295, %s1469_s24   ;;  %s1260_s26 = sadd.s32 4294967294, %s1469_s24   ;;  %s1469_s24 = sphi %s1526_s24, %s2339_s24   ;;  %s1465_s23 = sphi %s1524_s23, %s2338_s23   ;;  %s1461_s22 = sphi %s1522_s22, %s2337_s22   ;;  %s1457_s21 = sphi %s1520_s21, %s2336_s21  }
   0x6   : > { %s1545_s27 = sadd.s32 1, %s1469_s24   ;;  %s29_s28 = sadd.s32 1, %s1465_s23 }
   0x7   : > { %s26_s29 = ssub.s32 %s1469_s24, %s1545_s27  ;;  %p36_p0 = scmp.ne.s32.totalorder %s1465_s23, %s1461_s22 }
   0x8   : > { %p27_p1 = scmp.eq.s32.totalorder %s26_s29, 0  ;;  %p37_p2 = scmp.eq.s32.totalorder %s1469_s24, 0 }
   0x9   : > { %p42_p3 = scmp.ne.s32.totalorder %s1461_s22, %s1457_s21  ;;  %p43_p4 = scmp.eq.s32.totalorder %s1541_s25, 0 }
   0xa   : > { %s1557_s30 = scalar_select %p27_p1, %s1465_s23, %s29_s28  }
   0xb   : > { %p1559_p5 = por %p37_p2, %p36_p0  ;;  %p1563_p6 = por %p43_p4, %p42_p3 }
   0xc   : > { %p171_p7 = scmp.eq.s32.totalorder %s1541_s25, 1  ;;  %p177_p8 = scmp.eq.s32.totalorder %s1260_s26, 1 }
   0xd   : > { %p1309_p10 = scmp.lt.s32.totalorder %s1469_s24, 2  ;;  %s212_s11 = sand.u32 1, %s1465_s23  }
   0xe   : > { %p1570_p11 = por %p171_p7, %p36_p0  ;;  %p1574_p12 = por %p177_p8, %p42_p3 }
   0xf   : > { %s1289_s12 = sshll.u32 %s1469_s24, 7  ;;  %s1263_s13 = sshll.u32 %s212_s11, 3 }
  0x10   : > { %s2232_s9 = scalar_select %p1570_p11, 1, 0 }
  0x11   : > { %s2233_s10 = scalar_select %p1574_p12, 1, 0 }
  0x12   : > { %s1583_s16 = scalar_lea.hbm %s2196_s0, %s1289_s12  ;;  %s216_s17 = scalar_lea.vmem [#allocation2], %s1263_s13 }
  0x13   : > { %s224_s18 = sshll.u32 %s216_s17, 4  ;;  %p1587_p13 = pnand %p1309_p10, %p1559_p5  ;;  %s1591_s18 = int_to_ptr.vmem [resolvable:$true] %s224_s18 }
  0x14   : > { %s213_s20 = scalar_lea.sflag [#allocation3], %s212_s11  ;;  %s1373_s26 = scalar_lea.hbm %s1583_s16, 128 }
  0x15   : > { %p1374_p2 = scmp.ne.s32.totalorder %s1583_s16, %s1373_s26  ;;  %p1375_p3 = pneg %p1587_p13 }
  0x16   : > { %s1378_s7 = scalar_lea.hbm %s2196_s0, 256  ;;  %p1379_p5 = scmp.lt.u32.totalorder %s1583_s16, %s2196_s0 }
  0x17   : > { %p1376_p4 = pnand %p1375_p3, %p1374_p2  ;;  %p1380_p8 = scmp.lt.u32.totalorder %s1378_s7, %s1373_s26 }
  0x18   : > { %p1382_p9 = scmp.lt.u32.totalorder %s1373_s26, %s1583_s16 }
  0x19   : > { %p1377_p7 = pneg %p1376_p4  ;;  %p1381_p10 = por %p1380_p8, %p1379_p5 }
  0x1b   : > { %p1383_p0 = por %p1382_p9, %p1381_p10 }
  0x1d   : > { %p1384_p1 = pnand %p1383_p0, %p1377_p7 }
  0x1f   : > { %1387 = shalt.err (!%p1384_p1)
}
  0x20   : > { %s1388_s11 = scalar_lea.vmem %s1591_s18, 128  ;;  %s1471_s14 = smov [#allocation2]  }
  0x21   : > { %p1389_p2 = scmp.ne.s32.totalorder %s1591_s18, %s1388_s11  ;;  %s1393_s15 = sshll.u32 %s1471_s14, 4  ;;  %s1394_s15 = int_to_ptr.vmem [resolvable:$false] %s1393_s15 }
  0x22   : > { %s1395_s17 = scalar_lea.vmem %s1394_s15, 256  ;;  %p1396_p11 = scmp.lt.s32.totalorder %s1591_s18, %s1394_s15 }
  0x23   : > { %p1391_p4 = pnand %p1389_p2, %p1375_p3  ;;  %p1397_p5 = scmp.lt.s32.totalorder %s1395_s17, %s1388_s11 }
  0x25   : > { %p1392_p12 = pneg %p1391_p4  ;;  %p1398_p8 = por %p1397_p5, %p1396_p11 }
  0x27   : > { %p1399_p9 = pnand %p1398_p8, %p1392_p12 }
  0x29   : > { %1402 = shalt.err (!%p1399_p9)
}
  0x2a   : > { %1304 = dma.hbm_to_vmem [thread:$0]  (!%p1587_p13), %s1583_s16, 128, %s1591_s18, %s213_s20  }
  0x2b   : > { %p2235_p0 = scmp.lt.s32.totalorder %s1469_s24, 3  ;;  %p2236_p1 = scmp.ge.s32.totalorder %s1469_s24, 1 }
  0x2d   : > { %p230_p3 = pnand %p2236_p1, %p2235_p0 }
  0x2e   : > { %s1625_s26 = sand.u32 (!%p230_p3), 1, %s1461_s22  }
  0x2f   : > { %233 = sbr.rel (%p230_p3) target bundleno = 1357 (0x54d), region = 44  ;;  %s1267_s28 = sshll.u32 (!%p230_p3), %s1625_s26, 3 }
  0x30   : > { %s236_s29 = scalar_lea.sflag (!%p230_p3), [#allocation3], %s1625_s26  ;;  %s239_s19 = scalar_lea.vmem (!%p230_p3), [#allocation2], %s1267_s28 }
  0x36   : > { %1448 = dma.done.wait (%p1563_p6), %s236_s29, 128  }
  0x37   : > { %1450 = vsyncadd (%p1563_p6), %s236_s29, 4294967168  ;;  %v1472_v0 = vmov 0.0   ;;  %v1473_v1 = vmov 0   ;;  %v268_v2 = vld [vmem:[%s239_s19] sm:$0xff]  ;;  %vm282_vm0 = vcmask 1043456   ;;  %vm278_vm1 = vcmask 31744  }
  0x38   : > { %351 = vmatprep.mubr.f32.mxu0 %v1472_v0  ;;  %975 = vmatprep.mubr.f32.mxu1 %v1472_v0  ;;  %v277_v3 = vcombine.high %v268_v2, %v268_v2  ;;  %v270_v4 = vld [vmem:[%s2198_s2] sm:$0x3]  ;;  %v374_v6 = vlaneseq  ;;  %s1474_s13 = smov 1   ;;  %s1475_s11 = smov 127   ;;  %vm2208_vm2 = vcmask 1041408  }
  0x39   : > { %1355 = vset.pattern.permute.xlu0 %v1473_v1  ;;  %v269_v5 = vld [vmem:[%s2197_s1] sm:$0x3]  ;;  %s1476_s14 = smov 2   ;;  %s1477_s15 = smov 126  }
  0x3a   : > { %273 = vperm.xlu0 %1355, %v270_v4   ;;  %1269 = vmatprep.subr.msk.mxu0 %vm282_vm0, %v277_v3  ;;  %v375_v7 = vshrl.u32 %v374_v6, 7  ;;  %v372_v10 = vld [vmem:[%s2201_s5] sm:$0x3]  ;;  %s1478_s17 = smov 16   ;;  %s1479_s29 = smov 112   ;;  %v1713_v34 = vand.u32 127, %v374_v6 }
  0x3b   : > { %1270 = vmatpush1.msk.msra.mxu0 %vm282_vm0, %v268_v2  ;;  %s1480_s19 = smov 32   ;;  %s1481_s16 = smov 96   ;;  %v2237_v3 = vmov 0  ;;  %v2239_v6 = vmov 0 }
  0x3c   : > { %1271 = vmatmul.mubr.msk.f32.vlgmr.msra.gmra.mrb[0].mxu0 %vm278_vm1, %v269_v5  ;;  %v1646_v8 = vsub.s32 0, %v375_v7  ;;  %v380_v9 = vsub.s32 1, %v375_v7  ;;  %vm2207_vm3 = vcmp.lt.s32.totalorder %v1713_v34, 1  ;;  %vm2206_vm4 = vcmp.lt.s32.totalorder %v1713_v34, 127  ;;  %s1482_s7 = smov 124   ;;  %s1483_s8 = smov 122  }
  0x3d   : > { %896 = vmatprep.mubr.f32.mxu0 %v1472_v0  ;;  %vm2205_vm5 = vcmp.lt.s32.totalorder %v1713_v34, 2  ;;  %vm2204_vm8 = vcmp.lt.s32.totalorder %v1713_v34, 126  ;;  %p2333_p11 = scmp.ne.s32.totalorder %s2232_s9, 0 }
  0x3e   : > { %v1652_v11 = vrot.slane %v372_v10, %v1646_v8  ;;  %v1654_v12 = vrot.slane %v372_v10, %v380_v9 }
  0x40   : > { %386 = vrot.lane.b32.xlu1 %v1654_v12, %s1474_s13  ;;  %384 = vrot.lane.b32.xlu0 %v1652_v11, %s1474_s13 }
  0x44   : > { %395 = vrot.lane.b32.xlu1 %v1652_v11, %s1475_s11  ;;  %397 = vrot.lane.b32.xlu0 %v1654_v12, %s1475_s11 }
  0x48   : > { %434 = vrot.lane.b32.xlu1 %v1652_v11, %s1476_s14  ;;  %436 = vrot.lane.b32.xlu0 %v1654_v12, %s1476_s14 }
  0x4c   : > { %443 = vrot.lane.b32.xlu1 %v1652_v11, %s1477_s15  ;;  %445 = vrot.lane.b32.xlu0 %v1654_v12, %s1477_s15 }
  0xb2   : > { %v387_v30 = vpop.permute.xlu1 %386 }
  0xb6   : > { %v396_v32 = vpop.permute.xlu1 %395 }
  0xb9   : > { %v274_v13 = vpop.permute.xlu0 %273 }
  0xba   : > { %v435_v35 = vpop.permute.xlu1 %434 }
  0xbd   : > { %v385_v31 = vpop.permute.xlu0 %384 }
  0xbe   : > { %v392_v37 = vsel %vm2207_vm3, %v387_v30, %v385_v31  ;;  %v391_v38 = vsel %vm2207_vm3, %v385_v31, %v387_v30  ;;  %v444_v40 = vpop.permute.xlu1 %443 }
  0xbf   : > { %vm393_vm6 = vcmp.eq.f32.partialorder %v392_v37, %v1652_v11  ;;  %vm394_vm7 = vcmp.eq.f32.partialorder %v391_v38, %v1654_v12 }
  0xc0   : > { %v488_v45 = vsel %vm393_vm6, 1, %v1473_v1  ;;  %v489_v46 = vsel %vm394_vm7, 1, %v1473_v1 }
  0xc1   : > { %v398_v33 = vpop.permute.xlu0 %397  ;;  %v493_v51 = vrot.slane %v488_v45, %v1646_v8  ;;  %v497_v55 = vrot.slane %v489_v46, %v1646_v8 }
  0xc2   : > { %v400_v39 = vsel %vm2206_vm4, %v396_v32, %v398_v33  ;;  %v401_v41 = vsel %vm2206_vm4, %v398_v33, %v396_v32 }
  0xc3   : > { %vm402_vm9 = vcmp.eq.f32.partialorder %v400_v39, %v1652_v11  ;;  %vm403_vm10 = vcmp.eq.f32.partialorder %v401_v41, %v1654_v12  ;;  %vm1760_vm15 = vcmp.eq.s32.totalorder %v493_v51, 1  ;;  %vm1765_vm0 = vcmp.eq.s32.totalorder %v497_v55, 1 }
  0xc4   : > { %v510_v48 = vsel %vm402_vm9, 1, %v1473_v1  ;;  %v511_v52 = vsel %vm403_vm10, 1, %v1473_v1  ;;  %v2238_v3 = vsel %vm1760_vm15, 4294967295, %v2237_v3  ;;  %v2240_v6 = vsel %vm1765_vm0, 4294967295, %v2239_v6 }
  0xc5   : > { %v437_v36 = vpop.permute.xlu0 %436  ;;  %v515_v57 = vrot.slane %v510_v48, %v1646_v8  ;;  %v519_v58 = vrot.slane %v511_v52, %v1646_v8 }
  0xc6   : > { %v440_v42 = vsel %vm2205_vm5, %v437_v36, %v435_v35  ;;  %v439_v44 = vsel %vm2205_vm5, %v435_v35, %v437_v36  ;;  %v2249_v36 = vmov 0 }
  0xc7   : > { %vm441_vm11 = vcmp.eq.f32.partialorder %v440_v42, %v1652_v11  ;;  %vm442_vm12 = vcmp.eq.f32.partialorder %v439_v44, %v1654_v12  ;;  %vm1778_vm1 = vcmp.eq.s32.totalorder %v515_v57, 1  ;;  %vm1782_vm6 = vcmp.eq.s32.totalorder %v519_v58, 1 }
  0xc8   : > { %v532_v53 = vsel %vm441_vm11, 1, %v1473_v1  ;;  %v533_v56 = vsel %vm442_vm12, 1, %v1473_v1  ;;  %vm2210_vm12 = vcmp.lt.s32.totalorder %v1713_v34, 16 }
  0xc9   : > { %v446_v43 = vpop.permute.xlu0 %445  ;;  %v537_v59 = vrot.slane %v532_v53, %v1646_v8  ;;  %v541_v63 = vrot.slane %v533_v56, %v1646_v8 }
  0xca   : > { %v448_v47 = vsel %vm2204_vm8, %v444_v40, %v446_v43  ;;  %v449_v49 = vsel %vm2204_vm8, %v446_v43, %v444_v40 }
  0xcb   : > { %vm450_vm13 = vcmp.eq.f32.partialorder %v448_v47, %v1652_v11  ;;  %vm451_vm14 = vcmp.eq.f32.partialorder %v449_v49, %v1654_v12  ;;  %vm1786_vm7 = vcmp.eq.s32.totalorder %v537_v59, 1  ;;  %vm1795_vm9 = vcmp.eq.s32.totalorder %v541_v63, 1 }
  0xcc   : > { %v554_v2 = vsel %vm450_vm13, 1, %v1473_v1  ;;  %v555_v5 = vsel %vm451_vm14, 1, %v1473_v1  ;;  %vm2209_vm13 = vcmp.lt.s32.totalorder %v1713_v34, 112  ;;  %vm2211_vm14 = vcmp.lt.s32.totalorder %v1713_v34, 32 }
 0x10f   : > { %v353_v14 = vpop.f32.mrb[0].mxu0 }
 0x110   : > { %v354_v15 = vadd.f32 %v353_v14, %v274_v13  ;;  %v355_v16 = vpop.f32.mrb[1].mxu0  ;;  %v559_v14 = vrot.slane %v554_v2, %v1646_v8 }
 0x111   : > { %v356_v17 = vadd.f32 %v355_v16, %v274_v13  ;;  %v2243_v16 = vmov 0 }
 0x112   : > { %v358_v18 = vsub.f32 0.0, %v354_v15  ;;  %v2244_v16 = vsel %vm1782_vm6, 4294967295, %v2243_v16  ;;  %vm1809_vm10 = vcmp.eq.s32.totalorder %v559_v14, 1 }
 0x113   : > { %v359_v19 = vsub.f32 0.0, %v356_v17  ;;  %v2250_v36 = vsel %vm1809_vm10, 4294967295, %v2249_v36 }
 0x114   : > { %v360_v20 = vmul.f32 1.442695, %v358_v18  ;;  %v2245_v18 = vmov 0 }
 0x115   : > { %v362_v21 = vmul.f32 1.442695, %v359_v19  ;;  %v2246_v18 = vsel %vm1786_vm7, 4294967295, %v2245_v18  ;;  %v563_v19 = vrot.slane %v555_v5, %v1646_v8  ;;  %v2253_v5 = vmov 0 }
 0x116   : > { %1357 = vpow2.f32 %v360_v20 }
 0x117   : > { %1359 = vpow2.f32 %v362_v21  ;;  %vm1813_vm11 = vcmp.eq.s32.totalorder %v563_v19, 1 }
 0x120   : > { %v1358_v22 = vpop.eup %1357 }
 0x121   : > { %v1360_v23 = vpop.eup %1359  ;;  %v364_v24 = vadd.f32 1.0, %v1358_v22  ;;  %v2247_v22 = vmov 0 }
 0x122   : > { %v365_v25 = vadd.f32 1.0, %v1360_v23  ;;  %v2248_v22 = vsel %vm1795_vm9, 4294967295, %v2247_v22 }
 0x123   : > { %1361 = vrcp.f32 %v364_v24 }
 0x124   : > { %1363 = vrcp.f32 %v365_v25 }
 0x12d   : > { %v1362_v26 = vpop.eup %1361 }
 0x12e   : > { %v1364_v27 = vpop.eup %1363  ;;  %v1672_v28 = vmul.f32 %v1362_v26, %v354_v15  ;;  %v2241_v15 = vmov 0 }
 0x12f   : > { %v1674_v29 = vmul.f32 %v1364_v27, %v356_v17  ;;  %v2242_v15 = vsel %vm1778_vm1, 4294967295, %v2241_v15 }
 0x130   : > { %482 = vrot.lane.b32.xlu1 %v1672_v28, %s1474_s13 }
 0x131   : > { %484 = vrot.lane.b32.xlu0 %v1674_v29, %s1474_s13  ;;  %1275 = vmatprep.subr.msk.mxu1 %vm2208_vm2, %v1674_v29 }
 0x132   : > { %1276 = vmatpush1.msk.msra.mxu1 %vm2208_vm2, %v1672_v28 }
 0x134   : > { %504 = vrot.lane.b32.xlu1 %v1672_v28, %s1475_s11 }
 0x135   : > { %506 = vrot.lane.b32.xlu0 %v1674_v29, %s1475_s11 }
 0x138   : > { %526 = vrot.lane.b32.xlu1 %v1672_v28, %s1476_s14 }
 0x139   : > { %528 = vrot.lane.b32.xlu0 %v1674_v29, %s1476_s14 }
 0x13c   : > { %548 = vrot.lane.b32.xlu1 %v1672_v28, %s1477_s15 }
 0x13d   : > { %550 = vrot.lane.b32.xlu0 %v1674_v29, %s1477_s15 }
 0x140   : > { %404 = vrot.lane.b32.xlu1 %v1652_v11, %s1478_s17 }
 0x141   : > { %406 = vrot.lane.b32.xlu0 %v1654_v12, %s1478_s17 }
 0x144   : > { %419 = vrot.lane.b32.xlu1 %v1652_v11, %s1479_s29 }
 0x145   : > { %421 = vrot.lane.b32.xlu0 %v1654_v12, %s1479_s29 }
 0x148   : > { %452 = vrot.lane.b32.xlu1 %v1652_v11, %s1480_s19 }
 0x149   : > { %454 = vrot.lane.b32.xlu0 %v1654_v12, %s1480_s19 }
 0x14c   : > { %467 = vrot.lane.b32.xlu1 %v1652_v11, %s1481_s16 }
 0x14d   : > { %469 = vrot.lane.b32.xlu0 %v1654_v12, %s1481_s16 }
 0x1a2   : > { %v483_v50 = vpop.permute.xlu1 %482 }
 0x1a3   : > { %v485_v54 = vpop.permute.xlu0 %484 }
 0x1a4   : > { %v486_v60 = vsel %vm2207_vm3, %v483_v50, %v485_v54  ;;  %v487_v61 = vsel %vm2207_vm3, %v485_v54, %v483_v50 }
 0x1a5   : > { %v500_v10 = vsel %vm1760_vm15, %v487_v61, -inf  ;;  %v501_v13 = vsel %vm1765_vm0, %v486_v60, -inf }
 0x1a6   : > { %v505_v62 = vpop.permute.xlu1 %504  ;;  %v502_v24 = vmax.f32 %v1672_v28, %v500_v10  ;;  %v503_v25 = vmax.f32 %v1674_v29, %v501_v13  ;;  %v2251_v28 = vmov 0 }
 0x1a7   : > { %v507_v4 = vpop.permute.xlu0 %506  ;;  %v2252_v28 = vsel %vm1813_vm11, 4294967295, %v2251_v28 }
 0x1a8   : > { %v508_v7 = vsel %vm2206_vm4, %v505_v62, %v507_v4  ;;  %v509_v9 = vsel %vm2206_vm4, %v507_v4, %v505_v62 }
 0x1a9   : > { %v522_v20 = vsel %vm1778_vm1, %v508_v7, -inf  ;;  %v523_v21 = vsel %vm1782_vm6, %v509_v9, -inf }
 0x1aa   : > { %v527_v17 = vpop.permute.xlu1 %526  ;;  %v524_v32 = vmax.f32 %v502_v24, %v522_v20  ;;  %v525_v33 = vmax.f32 %v503_v25, %v523_v21 }
 0x1ab   : > { %v529_v23 = vpop.permute.xlu0 %528 }
 0x1ac   : > { %v530_v26 = vsel %vm2205_vm5, %v527_v17, %v529_v23  ;;  %v531_v27 = vsel %vm2205_vm5, %v529_v23, %v527_v17 }
 0x1ad   : > { %v544_v30 = vsel %vm1786_vm7, %v531_v27, -inf  ;;  %v545_v31 = vsel %vm1795_vm9, %v530_v26, -inf }
 0x1ae   : > { %v549_v35 = vpop.permute.xlu1 %548  ;;  %v546_v37 = vmax.f32 %v524_v32, %v544_v30  ;;  %v547_v38 = vmax.f32 %v525_v33, %v545_v31 }
 0x1af   : > { %v551_v29 = vpop.permute.xlu0 %550 }
 0x1b0   : > { %v552_v39 = vsel %vm2204_vm8, %v549_v35, %v551_v29  ;;  %v553_v40 = vsel %vm2204_vm8, %v551_v29, %v549_v35  ;;  %vm2228_vm8 = vcmp.lt.s32.totalorder %v1713_v34, 96 }
 0x1b1   : > { %v566_v41 = vsel %vm1809_vm10, %v552_v39, -inf  ;;  %v567_v42 = vsel %vm1813_vm11, %v553_v40, -inf }
 0x1b2   : > { %v1825_v43 = vmax.f32 %v546_v37, %v566_v41  ;;  %v1827_v44 = vmax.f32 %v547_v38, %v567_v42  ;;  %v405_v46 = vpop.permute.xlu1 %404 }
 0x1b3   : > { %v407_v45 = vpop.permute.xlu0 %406 }
 0x1b4   : > { %572 = vrot.lane.b32.xlu0 %v1827_v44, %s1478_s17  ;;  %570 = vrot.lane.b32.xlu1 %v1825_v43, %s1478_s17  ;;  %v410_v49 = vsel %vm2210_vm12, %v407_v45, %v405_v46  ;;  %v409_v52 = vsel %vm2210_vm12, %v405_v46, %v407_v45 }
 0x1b5   : > { %v411_v54 = vsub.f32 %v410_v49, %v1652_v11  ;;  %v412_v56 = vsub.f32 %v409_v52, %v1654_v12 }
 0x1b6   : > { %v420_v48 = vpop.permute.xlu1 %419 }
 0x1b7   : > { %v422_v47 = vpop.permute.xlu0 %421  ;;  %vm413_vm5 = vcmp.eq.f32.partialorder %v411_v54, 1.0  ;;  %vm415_vm4 = vcmp.eq.f32.partialorder %v411_v54, -1.0  ;;  %vm414_vm3 = vcmp.eq.f32.partialorder %v412_v56, 1.0  ;;  %vm416_vm2 = vcmp.eq.f32.partialorder %v412_v56, -1.0 }
 0x1b8   : > { %594 = vrot.lane.b32.xlu0 %v1827_v44, %s1479_s29  ;;  %592 = vrot.lane.b32.xlu1 %v1825_v43, %s1479_s29  ;;  %v424_v53 = vsel %vm2209_vm13, %v420_v48, %v422_v47  ;;  %v425_v55 = vsel %vm2209_vm13, %v422_v47, %v420_v48  ;;  %vm418_vm9 = vmor %vm414_vm3, %vm416_vm2 }
 0x1b9   : > { %v426_v58 = vsub.f32 %v424_v53, %v1652_v11  ;;  %v427_v60 = vsub.f32 %v425_v55, %v1654_v12  ;;  %v577_v14 = vsel %vm418_vm9, 1, %v1473_v1  ;;  %vm2262_vm9 = vcmp.lt.s32.totalorder %v1713_v34, 112 }
 0x1ba   : > { %v453_v51 = vpop.permute.xlu1 %452 }
 0x1bb   : > { %v455_v50 = vpop.permute.xlu0 %454  ;;  %vm428_vm13 = vcmp.eq.f32.partialorder %v426_v58, 1.0  ;;  %vm430_vm12 = vcmp.eq.f32.partialorder %v426_v58, -1.0  ;;  %vm429_vm11 = vcmp.eq.f32.partialorder %v427_v60, 1.0  ;;  %vm431_vm10 = vcmp.eq.f32.partialorder %v427_v60, -1.0 }
 0x1bc   : > { %616 = vrot.lane.b32.xlu0 %v1827_v44, %s1480_s19  ;;  %614 = vrot.lane.b32.xlu1 %v1825_v43, %s1480_s19  ;;  %v458_v57 = vsel %vm2211_vm14, %v455_v50, %v453_v51  ;;  %v457_v59 = vsel %vm2211_vm14, %v453_v51, %v455_v50  ;;  %vm1869_vm14 = vmor %vm413_vm5, %vm415_vm4 }
 0x1bd   : > { %v459_v63 = vsub.f32 %v458_v57, %v1652_v11  ;;  %v460_v2 = vsub.f32 %v457_v59, %v1654_v12  ;;  %v2254_v5 = vsel %vm1869_vm14, 4294967295, %v2253_v5  ;;  %vm432_vm1 = vmor %vm428_vm13, %vm430_vm12 }
 0x1be   : > { %v468_v62 = vpop.permute.xlu1 %467  ;;  %vm433_vm4 = vmor %vm429_vm11, %vm431_vm10  ;;  %v598_v17 = vsel %vm432_vm1, 1, %v1473_v1 }
 0x1bf   : > { %v470_v61 = vpop.permute.xlu0 %469  ;;  %vm461_vm7 = vcmp.eq.f32.partialorder %v459_v63, 2.0  ;;  %vm463_vm6 = vcmp.eq.f32.partialorder %v459_v63, -2.0  ;;  %vm462_vm0 = vcmp.eq.f32.partialorder %v460_v2, 2.0  ;;  %vm464_vm15 = vcmp.eq.f32.partialorder %v460_v2, -2.0  ;;  %vm2263_vm10 = vmmov %vm2262_vm9 }
 0x1c0   : > { %638 = vrot.lane.b32.xlu0 %v1827_v44, %s1481_s16  ;;  %636 = vrot.lane.b32.xlu1 %v1825_v43, %s1481_s16  ;;  %v472_v4 = vsel %vm2228_vm8, %v468_v62, %v470_v61  ;;  %v473_v7 = vsel %vm2228_vm8, %v470_v61, %v468_v62  ;;  %vm465_vm5 = vmor %vm461_vm7, %vm463_vm6  ;;  %vm2255_vm8 = vnez %v2254_v5  ;;  %v599_v19 = vsel %vm433_vm4, 1, %v1473_v1 }
 0x1c1   : > { %v474_v9 = vsub.f32 %v472_v4, %v1652_v11  ;;  %v475_v10 = vsub.f32 %v473_v7, %v1654_v12  ;;  %vm466_vm14 = vmor %vm462_vm0, %vm464_vm15  ;;  %v576_v13 = vsel %vm2255_vm8, 1, %v1473_v1  ;;  %v585_v12 = vrot.slane %v577_v14, %v1646_v8 }
 0x1c2   : > { %v581_v20 = vrot.slane %v576_v13, %v1646_v8  ;;  %v620_v23 = vsel %vm465_vm5, 1, %v1473_v1  ;;  %v621_v24 = vsel %vm466_vm14, 1, %v1473_v1  ;;  %v603_v25 = vrot.slane %v598_v17, %v1646_v8 }
 0x1c3   : > { %vm476_vm2 = vcmp.eq.f32.partialorder %v474_v9, 2.0  ;;  %vm478_vm3 = vcmp.eq.f32.partialorder %v474_v9, -2.0  ;;  %vm477_vm12 = vcmp.eq.f32.partialorder %v475_v10, 2.0  ;;  %vm479_vm13 = vcmp.eq.f32.partialorder %v475_v10, -2.0 }
 0x1c4   : > { %vm480_vm8 = vmor %vm476_vm2, %vm478_vm3  ;;  %v607_v26 = vrot.slane %v599_v19, %v1646_v8  ;;  %vm2256_vm0 = vcmp.lt.s32.totalorder %v1713_v34, 16  ;;  %v625_v31 = vrot.slane %v620_v23, %v1646_v8  ;;  %v629_v32 = vrot.slane %v621_v24, %v1646_v8 }
 0x1c5   : > { %vm481_vm15 = vmor %vm477_vm12, %vm479_vm13  ;;  %vm1895_vm6 = vcmp.eq.s32.totalorder %v581_v20, 1  ;;  %vm1899_vm7 = vcmp.eq.s32.totalorder %v585_v12, 1  ;;  %v642_v40 = vsel %vm480_vm8, 1, %v1473_v1  ;;  %vm1913_vm11 = vcmp.eq.s32.totalorder %v603_v25, 1 }
 0x1c6   : > { %vm2257_vm1 = vmmov %vm2256_vm0  ;;  %v643_v41 = vsel %vm481_vm15, 1, %v1473_v1  ;;  %vm1917_vm14 = vcmp.eq.s32.totalorder %v607_v26, 1  ;;  %vm1921_vm4 = vcmp.eq.s32.totalorder %v625_v31, 1  ;;  %vm1925_vm5 = vcmp.eq.s32.totalorder %v629_v32, 1 }
 0x1c7   : > { %v647_v53 = vrot.slane %v642_v40, %v1646_v8  ;;  %v651_v54 = vrot.slane %v643_v41, %v1646_v8  ;;  %vm2272_vm2 = vcmp.lt.s32.totalorder %v1713_v34, 32  ;;  %vm2278_vm8 = vcmp.lt.s32.totalorder %v1713_v34, 96 }
 0x1c8   : > { %vm2273_vm3 = vmmov %vm2272_vm2 }
 0x1c9   : > { %vm1945_vm12 = vcmp.eq.s32.totalorder %v647_v53, 1  ;;  %vm1949_vm13 = vcmp.eq.s32.totalorder %v651_v54, 1  ;;  %vm2279_vm15 = vmmov %vm2278_vm8 }
 0x226   : > { %v573_v11 = vpop.permute.xlu0 %572  ;;  %v571_v21 = vpop.permute.xlu1 %570 }
 0x227   : > { %v574_v27 = vsel %vm2256_vm0, %v571_v21, %v573_v11  ;;  %v575_v30 = vsel %vm2257_vm1, %v573_v11, %v571_v21  ;;  %vm2280_vm0 = vcmask 1041408  }
 0x228   : > { %v588_v42 = vsel %vm1895_vm6, %v575_v30, -inf  ;;  %v589_v45 = vsel %vm1899_vm7, %v574_v27, -inf  ;;  %vm2281_vm1 = vmmov %vm2280_vm0 }
 0x229   : > { %v590_v55 = vmax.f32 %v1825_v43, %v588_v42  ;;  %v591_v56 = vmax.f32 %v1827_v44, %v589_v45 }
 0x22a   : > { %v595_v29 = vpop.permute.xlu0 %594  ;;  %v593_v37 = vpop.permute.xlu1 %592 }
 0x22b   : > { %v596_v38 = vsel %vm2262_vm9, %v593_v37, %v595_v29  ;;  %v597_v39 = vsel %vm2263_vm10, %v595_v29, %v593_v37  ;;  %vm2282_vm9 = vcmp.lt.s32.totalorder %v1713_v34, 1 }
 0x22c   : > { %v610_v49 = vsel %vm1913_vm11, %v596_v38, -inf  ;;  %v611_v50 = vsel %vm1917_vm14, %v597_v39, -inf  ;;  %vm2283_vm10 = vmmov %vm2282_vm9 }
 0x22d   : > { %v612_v61 = vmax.f32 %v590_v55, %v610_v49  ;;  %v613_v62 = vmax.f32 %v591_v56, %v611_v50 }
 0x22e   : > { %v617_v51 = vpop.permute.xlu0 %616  ;;  %v615_v52 = vpop.permute.xlu1 %614 }
 0x22f   : > { %v618_v57 = vsel %vm2272_vm2, %v615_v52, %v617_v51  ;;  %v619_v58 = vsel %vm2273_vm3, %v617_v51, %v615_v52  ;;  %vm2284_vm2 = vcmp.lt.s32.totalorder %v1713_v34, 127 }
 0x230   : > { %v632_v59 = vsel %vm1921_vm4, %v619_v58, -inf  ;;  %v633_v60 = vsel %vm1925_vm5, %v618_v57, -inf  ;;  %vm2285_vm3 = vmmov %vm2284_vm2 }
 0x231   : > { %v634_v2 = vmax.f32 %v612_v61, %v632_v59  ;;  %v635_v4 = vmax.f32 %v613_v62, %v633_v60  ;;  %v2010_v59 = vld [vmem:[%s2199_s3] sm:$0xf] }
 0x232   : > { %v639_v63 = vpop.permute.xlu0 %638  ;;  %v637_v44 = vpop.permute.xlu1 %636 }
 0x233   : > { %v640_v5 = vsel %vm2278_vm8, %v637_v44, %v639_v63  ;;  %v641_v7 = vsel %vm2279_vm15, %v639_v63, %v637_v44  ;;  %vm2286_vm8 = vnez %v2238_v3  ;;  %vm2287_vm15 = vnez %v2240_v6 }
 0x234   : > { %v654_v9 = vsel %vm1945_vm12, %v640_v5, -inf  ;;  %v655_v10 = vsel %vm1949_vm13, %v641_v7, -inf }
 0x235   : > { %v656_v13 = vmax.f32 %v634_v2, %v654_v9  ;;  %v657_v14 = vmax.f32 %v635_v4, %v655_v10 }
 0x237   : > { %660 = vrot.lane.b32.xlu0 %v657_v14, %s1474_s13  ;;  %1272 = vmatprep.subr.msk.mxu0 %vm2280_vm0, %v657_v14  ;;  %vm2288_vm0 = vnez %v2242_v15 }
 0x238   : > { %658 = vrot.lane.b32.xlu1 %v656_v13, %s1474_s13  ;;  %1273 = vmatpush1.msk.msra.mxu0 %vm2281_vm1, %v656_v13  ;;  %vm2289_vm1 = vnez %v2244_v16 }
 0x23b   : > { %670 = vrot.lane.b32.xlu0 %v657_v14, %s1475_s11 }
 0x23c   : > { %668 = vrot.lane.b32.xlu1 %v656_v13, %s1475_s11 }
 0x23f   : > { %680 = vrot.lane.b32.xlu0 %v657_v14, %s1476_s14 }
 0x240   : > { %678 = vrot.lane.b32.xlu1 %v656_v13, %s1476_s14 }
 0x243   : > { %690 = vrot.lane.b32.xlu0 %v657_v14, %s1477_s15 }
 0x244   : > { %688 = vrot.lane.b32.xlu1 %v656_v13, %s1477_s15 }
 0x2a9   : > { %v661_v17 = vpop.permute.xlu0 %660 }
 0x2aa   : > { %v659_v19 = vpop.permute.xlu1 %658 }
 0x2ab   : > { %v662_v11 = vsel %vm2282_vm9, %v659_v19, %v661_v17  ;;  %v663_v20 = vsel %vm2283_vm10, %v661_v17, %v659_v19  ;;  %vm2290_vm9 = vcmp.lt.s32.totalorder %v1713_v34, 2 }
 0x2ac   : > { %v664_v25 = vsel %vm2286_vm8, %v663_v20, -inf  ;;  %v665_v26 = vsel %vm2287_vm15, %v662_v11, -inf  ;;  %vm2291_vm10 = vmmov %vm2290_vm9 }
 0x2ad   : > { %v671_v12 = vpop.permute.xlu0 %670  ;;  %v666_v29 = vmax.f32 %v656_v13, %v664_v25  ;;  %v667_v37 = vmax.f32 %v657_v14, %v665_v26 }
 0x2ae   : > { %v669_v21 = vpop.permute.xlu1 %668 }
 0x2af   : > { %v672_v23 = vsel %vm2284_vm2, %v669_v21, %v671_v12  ;;  %v673_v24 = vsel %vm2285_vm3, %v671_v12, %v669_v21  ;;  %vm2292_vm2 = vnez %v2246_v18  ;;  %vm2293_vm3 = vnez %v2248_v22 }
 0x2b0   : > { %v674_v30 = vsel %vm2288_vm0, %v672_v23, -inf  ;;  %v675_v31 = vsel %vm2289_vm1, %v673_v24, -inf  ;;  %vm2294_vm1 = vcmp.lt.s32.totalorder %v1713_v34, 126 }
 0x2b1   : > { %v681_v27 = vpop.permute.xlu0 %680  ;;  %v676_v42 = vmax.f32 %v666_v29, %v674_v30  ;;  %v677_v45 = vmax.f32 %v667_v37, %v675_v31 }
 0x2b2   : > { %v679_v32 = vpop.permute.xlu1 %678 }
 0x2b3   : > { %v682_v38 = vsel %vm2290_vm9, %v679_v32, %v681_v27  ;;  %v683_v39 = vsel %vm2291_vm10, %v681_v27, %v679_v32  ;;  %vm2295_vm9 = vmmov %vm2294_vm1  ;;  %vm2296_vm10 = vnez %v2250_v36 }
 0x2b4   : > { %v684_v40 = vsel %vm2292_vm2, %v683_v39, -inf  ;;  %v685_v41 = vsel %vm2293_vm3, %v682_v38, -inf  ;;  %vm2297_vm2 = vnez %v2252_v28 }
 0x2b5   : > { %v691_v49 = vpop.permute.xlu0 %690  ;;  %v686_v51 = vmax.f32 %v676_v42, %v684_v40  ;;  %v687_v52 = vmax.f32 %v677_v45, %v685_v41 }
 0x2b6   : > { %v689_v50 = vpop.permute.xlu1 %688 }
 0x2b7   : > { %v692_v53 = vsel %vm2294_vm1, %v689_v50, %v691_v49  ;;  %v693_v54 = vsel %vm2295_vm9, %v691_v49, %v689_v50  ;;  %vm2229_vm1 = vcmask 15360   ;;  %vm2298_vm9 = vcmp.lt.s32.totalorder %v1713_v34, 16 }
 0x2b8   : > { %v694_v55 = vsel %vm2296_vm10, %v692_v53, -inf  ;;  %v695_v56 = vsel %vm2297_vm2, %v693_v54, -inf  ;;  %1277 = vmatmul.mubr.msk.f32.vlgmr.msra.gmra.mrb[0].mxu1 %vm2229_vm1, %v2010_v59  ;;  %vm2299_vm2 = vmmov %vm2298_vm9  ;;  %vm2300_vm1 = vcmp.lt.s32.totalorder %v1713_v34, 112 }
 0x2b9   : > { %v696_v57 = vmax.f32 %v686_v51, %v694_v55  ;;  %v697_v58 = vmax.f32 %v687_v52, %v695_v56  ;;  %1056 = vmatprep.mubr.f32.mxu1 %v1472_v0  ;;  %vm2301_vm10 = vmmov %vm2300_vm1 }
 0x2bb   : > { %700 = vrot.lane.b32.xlu0 %v697_v58, %s1478_s17  ;;  %698 = vrot.lane.b32.xlu1 %v696_v57, %s1478_s17 }
 0x2bf   : > { %710 = vrot.lane.b32.xlu0 %v697_v58, %s1479_s29  ;;  %708 = vrot.lane.b32.xlu1 %v696_v57, %s1479_s29 }
 0x2c3   : > { %720 = vrot.lane.b32.xlu0 %v697_v58, %s1480_s19  ;;  %718 = vrot.lane.b32.xlu1 %v696_v57, %s1480_s19 }
 0x2c7   : > { %730 = vrot.lane.b32.xlu0 %v697_v58, %s1481_s16  ;;  %728 = vrot.lane.b32.xlu1 %v696_v57, %s1481_s16 }
 0x32d   : > { %v701_v60 = vpop.permute.xlu0 %700  ;;  %v699_v61 = vpop.permute.xlu1 %698 }
 0x32e   : > { %v702_v62 = vsel %vm2298_vm9, %v699_v61, %v701_v60  ;;  %v703_v63 = vsel %vm2299_vm2, %v701_v60, %v699_v61  ;;  %vm2302_vm2 = vcmp.lt.s32.totalorder %v1713_v34, 32 }
 0x32f   : > { %v704_v7 = vsel %vm1895_vm6, %v703_v63, -inf  ;;  %v705_v9 = vsel %vm1899_vm7, %v702_v62, -inf }
 0x330   : > { %v706_v19 = vmax.f32 %v696_v57, %v704_v7  ;;  %v707_v11 = vmax.f32 %v697_v58, %v705_v9 }
 0x331   : > { %v711_v44 = vpop.permute.xlu0 %710  ;;  %v709_v2 = vpop.permute.xlu1 %708 }
 0x332   : > { %v712_v4 = vsel %vm2300_vm1, %v709_v2, %v711_v44  ;;  %v713_v5 = vsel %vm2301_vm10, %v711_v44, %v709_v2  ;;  %vm2303_vm10 = vmmov %vm2302_vm2  ;;  %vm2304_vm1 = vcmp.lt.s32.totalorder %v1713_v34, 96 }
 0x333   : > { %v714_v10 = vsel %vm1913_vm11, %v712_v4, -inf  ;;  %v715_v13 = vsel %vm1917_vm14, %v713_v5, -inf  ;;  %vm2305_vm9 = vmmov %vm2304_vm1 }
 0x334   : > { %v716_v24 = vmax.f32 %v706_v19, %v714_v10  ;;  %v717_v25 = vmax.f32 %v707_v11, %v715_v13 }
 0x335   : > { %v721_v14 = vpop.permute.xlu0 %720  ;;  %v719_v17 = vpop.permute.xlu1 %718 }
 0x336   : > { %v722_v20 = vsel %vm2302_vm2, %v719_v17, %v721_v14  ;;  %v723_v12 = vsel %vm2303_vm10, %v721_v14, %v719_v17  ;;  %vm2306_vm2 = vcmask 1041408  }
 0x337   : > { %v724_v21 = vsel %vm1921_vm4, %v723_v12, -inf  ;;  %v725_v23 = vsel %vm1925_vm5, %v722_v20, -inf  ;;  %vm2307_vm10 = vmmov %vm2306_vm2 }
 0x338   : > { %v726_v30 = vmax.f32 %v716_v24, %v724_v21  ;;  %v727_v31 = vmax.f32 %v717_v25, %v725_v23 }
 0x339   : > { %v731_v26 = vpop.permute.xlu0 %730  ;;  %v729_v27 = vpop.permute.xlu1 %728 }
 0x33a   : > { %v732_v32 = vsel %vm2304_vm1, %v729_v27, %v731_v26  ;;  %v733_v29 = vsel %vm2305_vm9, %v731_v26, %v729_v27  ;;  %vm2308_vm1 = vcmp.lt.s32.totalorder %v1713_v34, 1 }
 0x33b   : > { %v734_v37 = vsel %vm1945_vm12, %v732_v32, -inf  ;;  %v735_v38 = vsel %vm1949_vm13, %v733_v29, -inf  ;;  %vm2309_vm9 = vmmov %vm2308_vm1 }
 0x33c   : > { %v736_v39 = vmax.f32 %v726_v30, %v734_v37  ;;  %v737_v40 = vmax.f32 %v727_v31, %v735_v38 }
 0x33e   : > { %740 = vrot.lane.b32.xlu0 %v737_v40, %s1474_s13  ;;  %738 = vrot.lane.b32.xlu1 %v736_v39, %s1474_s13 }
 0x33f   : > { %1278 = vmatprep.subr.msk.mxu1 %vm2306_vm2, %v737_v40  ;;  %vm2310_vm2 = vcmp.lt.s32.totalorder %v1713_v34, 127 }
 0x340   : > { %1279 = vmatpush1.msk.msra.mxu1 %vm2307_vm10, %v736_v39  ;;  %vm2311_vm10 = vmmov %vm2310_vm2 }
 0x342   : > { %750 = vrot.lane.b32.xlu0 %v737_v40, %s1475_s11  ;;  %748 = vrot.lane.b32.xlu1 %v736_v39, %s1475_s11  ;;  %s1290_s11 = sshll.u32 %s1541_s25, 7  ;;  %s1484_s25 = smov [#allocation5]  }
 0x346   : > { %760 = vrot.lane.b32.xlu0 %v737_v40, %s1476_s14  ;;  %758 = vrot.lane.b32.xlu1 %v736_v39, %s1476_s14  ;;  %s267_s14 = scalar_lea.vmem [#allocation5], %s1267_s28  ;;  %s1407_s28 = sshll.u32 %s1484_s25, 4  ;;  %s1408_s28 = int_to_ptr.vmem [resolvable:$false] %s1407_s28 }
 0x347   : > { %s1409_s20 = scalar_lea.vmem %s1408_s28, 256 }
 0x34a   : > { %770 = vrot.lane.b32.xlu0 %v737_v40, %s1477_s15  ;;  %768 = vrot.lane.b32.xlu1 %v736_v39, %s1477_s15 }
 0x34e   : > { %982 = vrot.lane.b32.xlu1 %v2010_v59, %s1482_s7 }
 0x3b0   : > { %v741_v41 = vpop.permute.xlu0 %740  ;;  %v739_v42 = vpop.permute.xlu1 %738 }
 0x3b1   : > { %v742_v45 = vsel %vm2308_vm1, %v739_v42, %v741_v41  ;;  %v743_v49 = vsel %vm2309_vm9, %v741_v41, %v739_v42  ;;  %vm2312_vm1 = vnez %v2244_v16  ;;  %vm2313_vm9 = vcmp.lt.s32.totalorder %v1713_v34, 2 }
 0x3b2   : > { %v744_v54 = vsel %vm2286_vm8, %v743_v49, -inf  ;;  %v745_v55 = vsel %vm2287_vm15, %v742_v45, -inf  ;;  %vm2315_vm8 = vnez %v2246_v18  ;;  %vm2316_vm15 = vcmp.lt.s32.totalorder %v1713_v34, 126 }
 0x3b3   : > { %v746_v61 = vmax.f32 %v736_v39, %v744_v54  ;;  %v747_v62 = vmax.f32 %v737_v40, %v745_v55 }
 0x3b4   : > { %v751_v50 = vpop.permute.xlu0 %750  ;;  %v749_v51 = vpop.permute.xlu1 %748 }
 0x3b5   : > { %v752_v52 = vsel %vm2310_vm2, %v749_v51, %v751_v50  ;;  %v753_v53 = vsel %vm2311_vm10, %v751_v50, %v749_v51  ;;  %vm2314_vm2 = vmmov %vm2313_vm9  ;;  %vm2318_vm10 = vnez %v2250_v36 }
 0x3b6   : > { %v754_v56 = vsel %vm2288_vm0, %v752_v52, -inf  ;;  %v755_v57 = vsel %vm2312_vm1, %v753_v53, -inf  ;;  %vm2317_vm0 = vmmov %vm2316_vm15  ;;  %vm2319_vm1 = vnez %v2252_v28 }
 0x3b7   : > { %v756_v44 = vmax.f32 %v746_v61, %v754_v56  ;;  %v757_v2 = vmax.f32 %v747_v62, %v755_v57 }
 0x3b8   : > { %v761_v58 = vpop.permute.xlu0 %760  ;;  %v759_v60 = vpop.permute.xlu1 %758 }
 0x3b9   : > { %v762_v63 = vsel %vm2313_vm9, %v759_v60, %v761_v58  ;;  %v763_v3 = vsel %vm2314_vm2, %v761_v58, %v759_v60  ;;  %vm2321_vm9 = vcmp.lt.s32.totalorder %v1713_v34, 16 }
 0x3ba   : > { %v764_v6 = vsel %vm2315_vm8, %v763_v3, -inf  ;;  %v765_v15 = vsel %vm2293_vm3, %v762_v63, -inf  ;;  %vm2320_vm3 = vcmask 15360   ;;  %vm2322_vm2 = vmmov %vm2321_vm9  ;;  %vm2323_vm8 = vcmp.lt.s32.totalorder %v1713_v34, 112 }
 0x3bb   : > { %v766_v5 = vmax.f32 %v756_v44, %v764_v6  ;;  %v767_v7 = vmax.f32 %v757_v2, %v765_v15 }
 0x3bc   : > { %v771_v16 = vpop.permute.xlu0 %770  ;;  %v769_v4 = vpop.permute.xlu1 %768 }
 0x3bd   : > { %v772_v9 = vsel %vm2316_vm15, %v769_v4, %v771_v16  ;;  %v773_v10 = vsel %vm2317_vm0, %v771_v16, %v769_v4  ;;  %vm2324_vm15 = vmmov %vm2323_vm8  ;;  %vm2325_vm0 = vcmp.lt.s32.totalorder %v1713_v34, 32 }
 0x3be   : > { %v774_v13 = vsel %vm2318_vm10, %v772_v9, -inf  ;;  %v775_v18 = vsel %vm2319_vm1, %v773_v10, -inf  ;;  %vm2326_vm10 = vmmov %vm2325_vm0 }
 0x3bf   : > { %v776_v22 = vmax.f32 %v766_v5, %v774_v13  ;;  %v777_v14 = vmax.f32 %v767_v7, %v775_v18 }
 0x3c0   : > { %v983_v17 = vpop.permute.xlu1 %982 }
 0x3c1   : > { %780 = vrot.lane.b32.xlu0 %v777_v14, %s1478_s17  ;;  %778 = vrot.lane.b32.xlu1 %v776_v22, %s1478_s17 }
 0x3c2   : > { %1280 = vmatmul.mubr.msk.f32.vlgmr.msra.gmra.mrb[0].mxu1 %vm2320_vm3, %v983_v17 }
 0x3c3   : > { %1139 = vmatprep.mubr.f32.mxu1 %v1472_v0  ;;  %v1148_v0 = vld [vmem:[%s2200_s4] sm:$0xf] }
 0x3c5   : > { %790 = vrot.lane.b32.xlu0 %v777_v14, %s1479_s29  ;;  %788 = vrot.lane.b32.xlu1 %v776_v22, %s1479_s29 }
 0x3c9   : > { %800 = vrot.lane.b32.xlu0 %v777_v14, %s1480_s19  ;;  %798 = vrot.lane.b32.xlu1 %v776_v22, %s1480_s19  ;;  %s2152_s19 = scalar_lea.hbm %s2202_s6, %s1290_s11 }
 0x3cd   : > { %808 = vrot.lane.b32.xlu0 %v776_v22, %s1481_s16  ;;  %810 = vrot.lane.b32.xlu1 %v777_v14, %s1481_s16  ;;  %s1176_s16 = scalar_lea.sflag [#allocation4], %s1625_s26 }
 0x3d1   : > { %820 = vrot.lane.b32.xlu0 %v2010_v59, %s1477_s15  ;;  %1065 = vrot.lane.b32.xlu1 %v2010_v59, %s1483_s8  ;;  %s1190_s15 = sshll.u32 %s267_s14, 4  ;;  %s2154_s15 = int_to_ptr.vmem [resolvable:$true] %s1190_s15 }
 0x3d2   : > { %s1403_s18 = scalar_lea.vmem %s2154_s15, 128  ;;  %p1410_p7 = scmp.lt.s32.totalorder %s2154_s15, %s1408_s28 }
 0x3d3   : > { %p1404_p6 = scmp.ne.s32.totalorder %s2154_s15, %s1403_s18  ;;  %p1411_p10 = scmp.lt.s32.totalorder %s1409_s20, %s1403_s18 }
 0x3d5   : > { %1151 = vperm.xlu0 %1355, %v1148_v0   ;;  %p1405_p12 = pnand %p1404_p6, %p2333_p11  ;;  %p1412_p2 = por %p1411_p10, %p1410_p7 }
 0x3d7   : > { %p1406_p13 = pneg %p1405_p12 }
 0x3d9   : > { %p1413_p4 = pnand %p1412_p2, %p1406_p13 }
 0x433   : > { %v781_v36 = vpop.permute.xlu0 %780  ;;  %v779_v28 = vpop.permute.xlu1 %778 }
 0x434   : > { %v782_v19 = vsel %vm2321_vm9, %v779_v28, %v781_v36  ;;  %v783_v11 = vsel %vm2322_vm2, %v781_v36, %v779_v28 }
 0x435   : > { %v784_v23 = vsel %vm1895_vm6, %v783_v11, -inf  ;;  %v785_v24 = vsel %vm1899_vm7, %v782_v19, -inf  ;;  %vm2327_vm6 = vcmp.lt.s32.totalorder %v1713_v34, 96 }
 0x436   : > { %v786_v31 = vmax.f32 %v776_v22, %v784_v23  ;;  %v787_v32 = vmax.f32 %v777_v14, %v785_v24  ;;  %vm2328_vm7 = vmmov %vm2327_vm6 }
 0x437   : > { %v791_v20 = vpop.permute.xlu0 %790  ;;  %v789_v12 = vpop.permute.xlu1 %788 }
 0x438   : > { %v792_v21 = vsel %vm2323_vm8, %v789_v12, %v791_v20  ;;  %v793_v59 = vsel %vm2324_vm15, %v791_v20, %v789_v12 }
 0x439   : > { %v794_v25 = vsel %vm1913_vm11, %v792_v21, -inf  ;;  %v795_v26 = vsel %vm1917_vm14, %v793_v59, -inf  ;;  %vm2329_vm11 = vcmask 1041408   ;;  %vm2330_vm14 = vmmov %vm2320_vm3 }
 0x43a   : > { %v796_v37 = vmax.f32 %v786_v31, %v794_v25  ;;  %v797_v38 = vmax.f32 %v787_v32, %v795_v26 }
 0x43b   : > { %v801_v27 = vpop.permute.xlu0 %800  ;;  %v799_v30 = vpop.permute.xlu1 %798 }
 0x43c   : > { %v802_v29 = vsel %vm2325_vm0, %v799_v30, %v801_v27  ;;  %v803_v33 = vsel %vm2326_vm10, %v801_v27, %v799_v30 }
 0x43d   : > { %v804_v35 = vsel %vm1921_vm4, %v803_v33, -inf  ;;  %v805_v46 = vsel %vm1925_vm5, %v802_v29, -inf  ;;  %vm2331_vm4 = vmmov %vm2329_vm11 }
 0x43e   : > { %v806_v40 = vmax.f32 %v796_v37, %v804_v35  ;;  %v807_v41 = vmax.f32 %v797_v38, %v805_v46  ;;  %vm2332_vm5 = vmmov %vm2320_vm3 }
 0x43f   : > { %v809_v47 = vpop.permute.xlu0 %808  ;;  %v811_v39 = vpop.permute.xlu1 %810 }
 0x440   : > { %v812_v42 = vsel %vm2327_vm6, %v809_v47, %v811_v39  ;;  %v813_v45 = vsel %vm2328_vm7, %v811_v39, %v809_v47 }
 0x441   : > { %v814_v49 = vsel %vm1945_vm12, %v812_v42, -inf  ;;  %v815_v48 = vsel %vm1949_vm13, %v813_v45, -inf }
 0x442   : > { %v816_v1 = vmax.f32 %v806_v40, %v814_v49  ;;  %v817_v50 = vmax.f32 %v807_v41, %v815_v48 }
 0x443   : > { %v821_v51 = vpop.permute.xlu0 %820  ;;  %v1066_v52 = vpop.permute.xlu1 %1065 }
 0x444   : > { %1281 = vmatprep.subr.msk.mxu1 %vm2329_vm11, %v817_v50  ;;  %1274 = vmatmul.mubr.msk.f32.vlgmr.msra.gmra.mrb[2].mxu0 %vm2330_vm14, %v821_v51 }
 0x445   : > { %1282 = vmatpush1.msk.msra.mxu1 %vm2331_vm4, %v816_v1 }
 0x446   : > { %1283 = vmatmul.mubr.msk.f32.vlgmr.msra.gmra.mrb[0].mxu1 %vm2332_vm5, %v1066_v52 }
 0x454   : > { %v1152_v56 = vpop.permute.xlu0 %1151 }
 0x517   : > { %v898_v34 = vpop.f32.mrb[2].mxu0 }
 0x518   : > { %v900_v53 = vpop.f32.mrb[3].mxu0 }
 0x519   : > { %v1141_v54 = vpop.f32.mrb[0].mxu1 }
 0x51a   : > { %v1291_v8 = vadd.f32 %v1141_v54, %v898_v34  ;;  %v1143_v55 = vpop.f32.mrb[1].mxu1 }
 0x51b   : > { %v1292_v43 = vadd.f32 %v1143_v55, %v900_v53 }
 0x51c   : > { %v1154_v57 = vadd.f32 %v1291_v8, %v1152_v56 }
 0x51d   : > { %v1155_v58 = vadd.f32 %v1292_v43, %v1152_v56 }
 0x51e   : > { %v1156_v60 = vsub.f32 0.0, %v1154_v57 }
 0x51f   : > { %v1157_v61 = vsub.f32 0.0, %v1155_v58 }
 0x520   : > { %v1158_v62 = vmul.f32 1.442695, %v1156_v60 }
 0x521   : > { %v1160_v63 = vmul.f32 1.442695, %v1157_v61 }
 0x522   : > { %1365 = vpow2.f32 %v1158_v62 }
 0x523   : > { %1367 = vpow2.f32 %v1160_v63 }
 0x52c   : > { %v1366_v3 = vpop.eup %1365 }
 0x52d   : > { %v1368_v6 = vpop.eup %1367  ;;  %v1162_v15 = vadd.f32 1.0, %v1366_v3 }
 0x52e   : > { %v1163_v44 = vadd.f32 1.0, %v1368_v6 }
 0x52f   : > { %1369 = vrcp.f32 %v1162_v15 }
 0x530   : > { %1371 = vrcp.f32 %v1163_v44 }
 0x539   : > { %v1370_v2 = vpop.eup %1369 }
 0x53a   : > { %v1372_v16 = vpop.eup %1371  ;;  %v1168_v4 = vmul.f32 %v1370_v2, %v1154_v57 }
 0x53b   : > { %v1169_v5 = vmul.f32 %v1372_v16, %v1155_v58 }
 0x53d   : > { %v1172_v7 = vcombine.low %v1168_v4, %v1169_v5 }
 0x53f   : > { %1174 = vst [vmem:[%s267_s14] sm:$0xff] %v1172_v7 }
 0x540   : > { %1416 = shalt.err (!%p1413_p4)
}
 0x541   : > { %s1417_s26 = scalar_lea.hbm %s2152_s19, 128  ;;  %s1421_s12 = scalar_lea.hbm %s2202_s6, 256 }
 0x542   : > { %p1418_p5 = scmp.ne.s32.totalorder %s2152_s19, %s1417_s26  ;;  %p1422_p0 = scmp.lt.u32.totalorder %s2152_s19, %s2202_s6 }
 0x543   : > { %p1423_p1 = scmp.lt.u32.totalorder %s1421_s12, %s1417_s26  ;;  %p1425_p6 = scmp.lt.u32.totalorder %s1417_s26, %s2152_s19 }
 0x544   : > { %p1419_p8 = pnand %p1418_p5, %p2333_p11 }
 0x545   : > { %p1424_p3 = por %p1423_p1, %p1422_p0 }
 0x546   : > { %p1420_p9 = pneg %p1419_p8 }
 0x547   : > { %p1426_p12 = por %p1425_p6, %p1424_p3 }
 0x549   : > { %p1427_p13 = pnand %p1426_p12, %p1420_p9 }
 0x54b   : > { %1430 = shalt.err (!%p1427_p13)
}
 0x54c   : > { %1299 = dma.vmem_to_hbm [thread:$0]  (%p2333_p11), %s2154_s15, 128, %s2152_s19, %s1176_s16  }
 0x54d PF: > { %s1202_s14 = sand.u32 1, %s1457_s21   ;;  %p2334_p7 = scmp.ne.s32.totalorder %s2233_s10, 0 }
 0x54e   : > { %p2335_p10 = scmp.ge.s32.totalorder %s1469_s24, 2  ;;  %s1203_s17 = scalar_lea.sflag [#allocation4], %s1202_s14 }
 0x550   : > { %p1306_p2 = pnand %p2335_p10, %p2334_p7 }
 0x552   : > { %1452 = dma.done.wait (!%p1306_p2), %s1203_s17, 128  }
 0x553   : > { %1454 = vsyncadd (!%p1306_p2), %s1203_s17, 4294967168  ;;  %p19_p4 = scmp.ge.s32.totalorder %s1545_s27, 4   ;;  %s2336_s21 = smov %s1461_s22 }
 0x554   : > { %s2337_s22 = smov %s1465_s23  ;;  %s2338_s23 = smov %s1557_s30 }
 0x555   : > { %s2339_s24 = smov %s1545_s27  ;;  %21 = sbr.rel (!%p19_p4) target bundleno = 5 (0x5), region = 89 }
 0x55c   :  { %1208 = vsyncpa [#allocation3], 1 }
 0x55d   :  { %1210 = vsyncpa [#allocation3 + $0x1], 1 }
 0x55e   :  { %1211 = vsyncpa [#allocation4], 1 }
 0x55f   :  { %1213 = vsyncpa [#allocation4 + $0x1], 1 }

</bundles_post_ra>
